<compile_context>
chip_gen: v6e
topology: v6e:2x2x1
jax: 0.10.0
libtpu: 0.0.40
codegen_flags: <defaults>
</compile_context>

<pallas_src>
import jax
import jax.numpy as jnp
from jax import lax
from jax.experimental import pallas as pl
from jax.experimental.pallas import tpu as pltpu

# Problem sizes (small, consistent with kernel_size=(360, 1) which needs H >= 360).
N = 2             # batch
H = 367           # input height (>= 360)
W = 8             # input width
KH = 360          # conv kernel height
C = 128           # conv output channels
HO = H - KH + 1   # = 8, conv output height
W2 = 2 * W        # = 16, width after upsample duplication
NC = HO * C       # = 1024, expanded-weight output width


def _sigmoid(x):
    # sigmoid(x) == 0.5*(tanh(x/2)+1): one EUP transcendental, no divide.
    return 0.5 * (jnp.tanh(0.5 * x) + 1.0)


def net_kernel(xt_ref, wext_ref, bext_ref, o_ref):
    # xt_ref:   (1, W, H)       one batch element, contraction axis (H) on lanes
    # wext_ref: (H, HO*C)       shifted expanded conv weight
    # bext_ref: (1, HO*C)       bias tiled per output row
    # o_ref:    (1, HO, W2, C)  channels-last output block for this batch element
    xt = xt_ref[0]                                            # (W, H)

    # One MXU matmul covers all HO conv output rows and all C channels.
    acc = jnp.dot(xt, wext_ref[...],
                  preferred_element_type=jnp.float32)          # (W, HO*C)

    # Triple sigmoid applied once, BEFORE width duplication (value-preserving).
    s = _sigmoid(_sigmoid(_sigmoid(acc + bext_ref[...])))      # (W, HO*C)

    # Scatter each lane-aligned 128-wide column block to its output row,
    # duplicating along width (Upsample x2 then ::2 on dim 2 == repeat along W).
    for i in range(HO):                                        # HO = 8, static
        si = s[:, i * C:(i + 1) * C]                           # (W, C), lane-tile aligned
        o_ref[0, i] = jnp.broadcast_to(si[:, None, :], (W, 2, C)).reshape(W2, C)


def net_forward(x_nchw, conv_w, conv_b):
    # x_nchw: (N, 1, H, W) float32
    x_t = jnp.transpose(x_nchw[:, 0, :, :], (0, 2, 1))        # (N, W, H): K on lanes

    # Expanded (shifted) weight: Wext[h, i*C + c] = W[h - i, c] for 0 <= h - i < KH.
    w2d = conv_w.reshape(C, KH).T                              # (KH, C)
    wext = jnp.concatenate(
        [jnp.pad(w2d, ((i, HO - 1 - i), (0, 0))) for i in range(HO)], axis=1
    )                                                          # (H, HO*C)
    bext = jnp.tile(conv_b.reshape(1, C), (1, HO))             # (1, HO*C)

    out_cl = pl.pallas_call(
        net_kernel,
        out_shape=jax.ShapeDtypeStruct((N, HO, W2, C), jnp.float32),
        grid=(N,),
        in_specs=[
            pl.BlockSpec((1, W, H), lambda n: (n, 0, 0)),
            pl.BlockSpec((H, NC), lambda n: (0, 0)),
            pl.BlockSpec((1, NC), lambda n: (0, 0)),
        ],
        out_specs=pl.BlockSpec((1, HO, W2, C), lambda n: (n, 0, 0, 0)),
        compiler_params=pltpu.CompilerParams(
            dimension_semantics=("parallel",)),
    )(x_t, wext, bext)

    # Glue: channels-last -> PyTorch output layout (N, HO, C, 2W).
    return jnp.transpose(out_cl, (0, 1, 3, 2))


def net_reference(x_nchw, conv_w, conv_b):
    # Pure-JAX reference of the PyTorch forward (eval mode).
    def sig(x):
        return 1.0 / (1.0 + jnp.exp(-x))
    a = lax.conv_general_dilated(
        x_nchw, conv_w, window_strides=(1, 1), padding="VALID",
        dimension_numbers=("NCHW", "OIHW", "NCHW"))
    a = a + conv_b.reshape(1, C, 1, 1)
    a = sig(a)                                       # (N, C, HO, W)
    b = jnp.transpose(a, (0, 2, 1, 3))               # (N, HO, C, W)
    c = sig(b)
    d = jnp.repeat(c, 2, axis=-1)                    # upsample x2 then ::2 on dim 2
    return sig(d)                                    # (N, HO, C, 2W)


if __name__ == "__main__":
    key = jax.random.PRNGKey(0)
    kx, kw, kb = jax.random.split(key, 3)

    # Deterministic parameter init (conv1 only; fc1/fc2/upsample have no params
    # used in the forward pass).
    x = jax.random.normal(kx, (N, 1, H, W), dtype=jnp.float32)
    conv_w = jax.random.normal(kw, (C, 1, KH, 1), dtype=jnp.float32) * 0.05
    conv_b = jax.random.normal(kb, (C,), dtype=jnp.float32) * 0.05

    out = jax.block_until_ready(net_forward(x, conv_w, conv_b))
    ref = jax.block_until_ready(net_reference(x, conv_w, conv_b))

    assert out.shape == (N, HO, C, W2), out.shape
    assert jnp.allclose(out, ref, atol=1e-5, rtol=1e-5), "mismatch vs reference"
    print("KERNEL_OK")
</pallas_src>

<mosaic_0001>
module attributes {stable_mosaic.version = 11 : i64} {
  func.func @net_kernel(%arg0: i32, %arg1: memref<1x8x367xf32, #tpu.memory_space<vmem>>, %arg2: memref<367x1024xf32, #tpu.memory_space<vmem>>, %arg3: memref<1x1024xf32, #tpu.memory_space<vmem>>, %arg4: memref<1x8x16x128xf32, #tpu.memory_space<vmem>>) attributes {dimension_semantics = [#tpu.dimension_semantics<parallel>], iteration_bounds = array<i64: 2>, scalar_prefetch = 0 : i64, scratch_operands = 0 : i64, tpu.core_type = #tpu.core_type<tc>, window_params = [{transform_indices = @transform_0, window_bounds = array<i64: 1, 8, 367>}, {pipeline_mode = #tpu.pipeline_mode<synchronous>, transform_indices = @transform_1, window_bounds = array<i64: 367, 1024>}, {pipeline_mode = #tpu.pipeline_mode<synchronous>, transform_indices = @transform_2, window_bounds = array<i64: 1, 1024>}, {transform_indices = @transform_3, window_bounds = array<i64: 1, 8, 16, 128>}]} {
    %c0 = arith.constant 0 : index
    %c0_0 = arith.constant 0 : index
    %c0_1 = arith.constant 0 : index
    %0 = vector.load %arg1[%c0, %c0_0, %c0_1] : memref<1x8x367xf32, #tpu.memory_space<vmem>>, vector<1x8x367xf32>
    %1 = vector.shape_cast %0 : vector<1x8x367xf32> to vector<8x367xf32>
    %c0_2 = arith.constant 0 : index
    %c0_3 = arith.constant 0 : index
    %2 = vector.load %arg2[%c0_2, %c0_3] : memref<367x1024xf32, #tpu.memory_space<vmem>>, vector<367x1024xf32>
    %cst = arith.constant dense<0.000000e+00> : vector<8x1024xf32>
    %3 = tpu.matmul %1, %2, %cst {dimension_numbers = #tpu.dot_dimension_numbers<[1], [0], [0], [1], [0, 0, 1, 1], [], []>} : vector<8x367xf32>, vector<367x1024xf32>, vector<8x1024xf32> -> vector<8x1024xf32>
    %c0_4 = arith.constant 0 : index
    %c0_5 = arith.constant 0 : index
    %4 = vector.load %arg3[%c0_4, %c0_5] : memref<1x1024xf32, #tpu.memory_space<vmem>>, vector<1x1024xf32>
    %5 = vector.broadcast %4 : vector<1x1024xf32> to vector<8x1024xf32>
    %6 = arith.addf %3, %5 : vector<8x1024xf32>
    %cst_6 = arith.constant 5.000000e-01 : f32
    %7 = vector.broadcast %cst_6 : f32 to vector<8x1024xf32>
    %8 = arith.mulf %7, %6 : vector<8x1024xf32>
    %9 = math.tanh %8 : vector<8x1024xf32>
    %cst_7 = arith.constant 1.000000e+00 : f32
    %10 = vector.broadcast %cst_7 : f32 to vector<8x1024xf32>
    %11 = arith.addf %9, %10 : vector<8x1024xf32>
    %cst_8 = arith.constant 5.000000e-01 : f32
    %12 = vector.broadcast %cst_8 : f32 to vector<8x1024xf32>
    %13 = arith.mulf %12, %11 : vector<8x1024xf32>
    %cst_9 = arith.constant 5.000000e-01 : f32
    %14 = vector.broadcast %cst_9 : f32 to vector<8x1024xf32>
    %15 = arith.mulf %14, %13 : vector<8x1024xf32>
    %16 = math.tanh %15 : vector<8x1024xf32>
    %cst_10 = arith.constant 1.000000e+00 : f32
    %17 = vector.broadcast %cst_10 : f32 to vector<8x1024xf32>
    %18 = arith.addf %16, %17 : vector<8x1024xf32>
    %cst_11 = arith.constant 5.000000e-01 : f32
    %19 = vector.broadcast %cst_11 : f32 to vector<8x1024xf32>
    %20 = arith.mulf %19, %18 : vector<8x1024xf32>
    %cst_12 = arith.constant 5.000000e-01 : f32
    %21 = vector.broadcast %cst_12 : f32 to vector<8x1024xf32>
    %22 = arith.mulf %21, %20 : vector<8x1024xf32>
    %23 = math.tanh %22 : vector<8x1024xf32>
    %cst_13 = arith.constant 1.000000e+00 : f32
    %24 = vector.broadcast %cst_13 : f32 to vector<8x1024xf32>
    %25 = arith.addf %23, %24 : vector<8x1024xf32>
    %cst_14 = arith.constant 5.000000e-01 : f32
    %26 = vector.broadcast %cst_14 : f32 to vector<8x1024xf32>
    %27 = arith.mulf %26, %25 : vector<8x1024xf32>
    %28 = vector.extract_strided_slice %27 {offsets = [0, 0], sizes = [8, 128], strides = [1, 1]} : vector<8x1024xf32> to vector<8x128xf32>
    %29 = vector.shape_cast %28 : vector<8x128xf32> to vector<8x1x128xf32>
    %30 = vector.shape_cast %29 : vector<8x1x128xf32> to vector<8x1x128xf32>
    %31 = vector.broadcast %30 : vector<8x1x128xf32> to vector<8x2x128xf32>
    %32 = vector.shape_cast %31 : vector<8x2x128xf32> to vector<16x128xf32>
    %c0_15 = arith.constant 0 : index
    %c0_16 = arith.constant 0 : index
    %c0_17 = arith.constant 0 : index
    %c0_18 = arith.constant 0 : index
    %33 = vector.load %arg4[%c0_15, %c0_16, %c0_17, %c0_18] : memref<1x8x16x128xf32, #tpu.memory_space<vmem>>, vector<1x1x16x128xf32>
    %34 = vector.shape_cast %33 : vector<1x1x16x128xf32> to vector<16x128xf32>
    %35 = vector.shape_cast %32 : vector<16x128xf32> to vector<1x1x16x128xf32>
    tpu.vector_store %arg4[%c0_15, %c0_16, %c0_17, %c0_18], %35 {strides = array<i32>} : memref<1x8x16x128xf32, #tpu.memory_space<vmem>>, vector<1x1x16x128xf32>,
    %36 = vector.extract_strided_slice %27 {offsets = [0, 128], sizes = [8, 128], strides = [1, 1]} : vector<8x1024xf32> to vector<8x128xf32>
    %37 = vector.shape_cast %36 : vector<8x128xf32> to vector<8x1x128xf32>
    %38 = vector.shape_cast %37 : vector<8x1x128xf32> to vector<8x1x128xf32>
    %39 = vector.broadcast %38 : vector<8x1x128xf32> to vector<8x2x128xf32>
    %40 = vector.shape_cast %39 : vector<8x2x128xf32> to vector<16x128xf32>
    %c0_19 = arith.constant 0 : index
    %c1 = arith.constant 1 : index
    %c0_20 = arith.constant 0 : index
    %c0_21 = arith.constant 0 : index
    %41 = vector.load %arg4[%c0_19, %c1, %c0_20, %c0_21] : memref<1x8x16x128xf32, #tpu.memory_space<vmem>>, vector<1x1x16x128xf32>
    %42 = vector.shape_cast %41 : vector<1x1x16x128xf32> to vector<16x128xf32>
    %43 = vector.shape_cast %40 : vector<16x128xf32> to vector<1x1x16x128xf32>
    tpu.vector_store %arg4[%c0_19, %c1, %c0_20, %c0_21], %43 {strides = array<i32>} : memref<1x8x16x128xf32, #tpu.memory_space<vmem>>, vector<1x1x16x128xf32>,
    %44 = vector.extract_strided_slice %27 {offsets = [0, 256], sizes = [8, 128], strides = [1, 1]} : vector<8x1024xf32> to vector<8x128xf32>
    %45 = vector.shape_cast %44 : vector<8x128xf32> to vector<8x1x128xf32>
    %46 = vector.shape_cast %45 : vector<8x1x128xf32> to vector<8x1x128xf32>
    %47 = vector.broadcast %46 : vector<8x1x128xf32> to vector<8x2x128xf32>
    %48 = vector.shape_cast %47 : vector<8x2x128xf32> to vector<16x128xf32>
    %c0_22 = arith.constant 0 : index
    %c2 = arith.constant 2 : index
    %c0_23 = arith.constant 0 : index
    %c0_24 = arith.constant 0 : index
    %49 = vector.load %arg4[%c0_22, %c2, %c0_23, %c0_24] : memref<1x8x16x128xf32, #tpu.memory_space<vmem>>, vector<1x1x16x128xf32>
    %50 = vector.shape_cast %49 : vector<1x1x16x128xf32> to vector<16x128xf32>
    %51 = vector.shape_cast %48 : vector<16x128xf32> to vector<1x1x16x128xf32>
    tpu.vector_store %arg4[%c0_22, %c2, %c0_23, %c0_24], %51 {strides = array<i32>} : memref<1x8x16x128xf32, #tpu.memory_space<vmem>>, vector<1x1x16x128xf32>,
    %52 = vector.extract_strided_slice %27 {offsets = [0, 384], sizes = [8, 128], strides = [1, 1]} : vector<8x1024xf32> to vector<8x128xf32>
    %53 = vector.shape_cast %52 : vector<8x128xf32> to vector<8x1x128xf32>
    %54 = vector.shape_cast %53 : vector<8x1x128xf32> to vector<8x1x128xf32>
    %55 = vector.broadcast %54 : vector<8x1x128xf32> to vector<8x2x128xf32>
    %56 = vector.shape_cast %55 : vector<8x2x128xf32> to vector<16x128xf32>
    %c0_25 = arith.constant 0 : index
    %c3 = arith.constant 3 : index
    %c0_26 = arith.constant 0 : index
    %c0_27 = arith.constant 0 : index
    %57 = vector.load %arg4[%c0_25, %c3, %c0_26, %c0_27] : memref<1x8x16x128xf32, #tpu.memory_space<vmem>>, vector<1x1x16x128xf32>
    %58 = vector.shape_cast %57 : vector<1x1x16x128xf32> to vector<16x128xf32>
    %59 = vector.shape_cast %56 : vector<16x128xf32> to vector<1x1x16x128xf32>
    tpu.vector_store %arg4[%c0_25, %c3, %c0_26, %c0_27], %59 {strides = array<i32>} : memref<1x8x16x128xf32, #tpu.memory_space<vmem>>, vector<1x1x16x128xf32>,
    %60 = vector.extract_strided_slice %27 {offsets = [0, 512], sizes = [8, 128], strides = [1, 1]} : vector<8x1024xf32> to vector<8x128xf32>
    %61 = vector.shape_cast %60 : vector<8x128xf32> to vector<8x1x128xf32>
    %62 = vector.shape_cast %61 : vector<8x1x128xf32> to vector<8x1x128xf32>
    %63 = vector.broadcast %62 : vector<8x1x128xf32> to vector<8x2x128xf32>
    %64 = vector.shape_cast %63 : vector<8x2x128xf32> to vector<16x128xf32>
    %c0_28 = arith.constant 0 : index
    %c4 = arith.constant 4 : index
    %c0_29 = arith.constant 0 : index
    %c0_30 = arith.constant 0 : index
    %65 = vector.load %arg4[%c0_28, %c4, %c0_29, %c0_30] : memref<1x8x16x128xf32, #tpu.memory_space<vmem>>, vector<1x1x16x128xf32>
    %66 = vector.shape_cast %65 : vector<1x1x16x128xf32> to vector<16x128xf32>
    %67 = vector.shape_cast %64 : vector<16x128xf32> to vector<1x1x16x128xf32>
    tpu.vector_store %arg4[%c0_28, %c4, %c0_29, %c0_30], %67 {strides = array<i32>} : memref<1x8x16x128xf32, #tpu.memory_space<vmem>>, vector<1x1x16x128xf32>,
    %68 = vector.extract_strided_slice %27 {offsets = [0, 640], sizes = [8, 128], strides = [1, 1]} : vector<8x1024xf32> to vector<8x128xf32>
    %69 = vector.shape_cast %68 : vector<8x128xf32> to vector<8x1x128xf32>
    %70 = vector.shape_cast %69 : vector<8x1x128xf32> to vector<8x1x128xf32>
    %71 = vector.broadcast %70 : vector<8x1x128xf32> to vector<8x2x128xf32>
    %72 = vector.shape_cast %71 : vector<8x2x128xf32> to vector<16x128xf32>
    %c0_31 = arith.constant 0 : index
    %c5 = arith.constant 5 : index
    %c0_32 = arith.constant 0 : index
    %c0_33 = arith.constant 0 : index
    %73 = vector.load %arg4[%c0_31, %c5, %c0_32, %c0_33] : memref<1x8x16x128xf32, #tpu.memory_space<vmem>>, vector<1x1x16x128xf32>
    %74 = vector.shape_cast %73 : vector<1x1x16x128xf32> to vector<16x128xf32>
    %75 = vector.shape_cast %72 : vector<16x128xf32> to vector<1x1x16x128xf32>
    tpu.vector_store %arg4[%c0_31, %c5, %c0_32, %c0_33], %75 {strides = array<i32>} : memref<1x8x16x128xf32, #tpu.memory_space<vmem>>, vector<1x1x16x128xf32>,
    %76 = vector.extract_strided_slice %27 {offsets = [0, 768], sizes = [8, 128], strides = [1, 1]} : vector<8x1024xf32> to vector<8x128xf32>
    %77 = vector.shape_cast %76 : vector<8x128xf32> to vector<8x1x128xf32>
    %78 = vector.shape_cast %77 : vector<8x1x128xf32> to vector<8x1x128xf32>
    %79 = vector.broadcast %78 : vector<8x1x128xf32> to vector<8x2x128xf32>
    %80 = vector.shape_cast %79 : vector<8x2x128xf32> to vector<16x128xf32>
    %c0_34 = arith.constant 0 : index
    %c6 = arith.constant 6 : index
    %c0_35 = arith.constant 0 : index
    %c0_36 = arith.constant 0 : index
    %81 = vector.load %arg4[%c0_34, %c6, %c0_35, %c0_36] : memref<1x8x16x128xf32, #tpu.memory_space<vmem>>, vector<1x1x16x128xf32>
    %82 = vector.shape_cast %81 : vector<1x1x16x128xf32> to vector<16x128xf32>
    %83 = vector.shape_cast %80 : vector<16x128xf32> to vector<1x1x16x128xf32>
    tpu.vector_store %arg4[%c0_34, %c6, %c0_35, %c0_36], %83 {strides = array<i32>} : memref<1x8x16x128xf32, #tpu.memory_space<vmem>>, vector<1x1x16x128xf32>,
    %84 = vector.extract_strided_slice %27 {offsets = [0, 896], sizes = [8, 128], strides = [1, 1]} : vector<8x1024xf32> to vector<8x128xf32>
    %85 = vector.shape_cast %84 : vector<8x128xf32> to vector<8x1x128xf32>
    %86 = vector.shape_cast %85 : vector<8x1x128xf32> to vector<8x1x128xf32>
    %87 = vector.broadcast %86 : vector<8x1x128xf32> to vector<8x2x128xf32>
    %88 = vector.shape_cast %87 : vector<8x2x128xf32> to vector<16x128xf32>
    %c0_37 = arith.constant 0 : index
    %c7 = arith.constant 7 : index
    %c0_38 = arith.constant 0 : index
    %c0_39 = arith.constant 0 : index
    %89 = vector.load %arg4[%c0_37, %c7, %c0_38, %c0_39] : memref<1x8x16x128xf32, #tpu.memory_space<vmem>>, vector<1x1x16x128xf32>
    %90 = vector.shape_cast %89 : vector<1x1x16x128xf32> to vector<16x128xf32>
    %91 = vector.shape_cast %88 : vector<16x128xf32> to vector<1x1x16x128xf32>
    tpu.vector_store %arg4[%c0_37, %c7, %c0_38, %c0_39], %91 {strides = array<i32>} : memref<1x8x16x128xf32, #tpu.memory_space<vmem>>, vector<1x1x16x128xf32>,
    return
  }
  func.func @transform_0(%arg0: i32) -> (i32, i32, i32) {
    %c0_i32 = arith.constant 0 : i32
    %c0_i32_0 = arith.constant 0 : i32
    %c0_i32_1 = arith.constant 0 : i32
    return %arg0, %c0_i32, %c0_i32_0 : i32, i32, i32
  }
  func.func @transform_1(%arg0: i32) -> (i32, i32) {
    %c0_i32 = arith.constant 0 : i32
    %c0_i32_0 = arith.constant 0 : i32
    %c0_i32_1 = arith.constant 0 : i32
    return %c0_i32, %c0_i32_0 : i32, i32
  }
  func.func @transform_2(%arg0: i32) -> (i32, i32) {
    %c0_i32 = arith.constant 0 : i32
    %c0_i32_0 = arith.constant 0 : i32
    %c0_i32_1 = arith.constant 0 : i32
    return %c0_i32, %c0_i32_0 : i32, i32
  }
  func.func @transform_3(%arg0: i32) -> (i32, i32, i32, i32) {
    %c0_i32 = arith.constant 0 : i32
    %c0_i32_0 = arith.constant 0 : i32
    %c0_i32_1 = arith.constant 0 : i32
    %c0_i32_2 = arith.constant 0 : i32
    return %arg0, %c0_i32, %c0_i32_0, %c0_i32_1 : i32, i32, i32, i32
  }
}

</mosaic_0001>

<bundles_post_ra>
// kernel: tpu_custom_call.1
= control target key start
LH: loop header
LB: loop body
LE: loop exit
PB: predicated region body
PF: predicated region fallthrough
CT: control target
= control target key end

     0   :  { %8 = vsyncpa [#allocation3], 0  ;;  %s3153_s0 = inlined_call_operand.hbm [shape: f32[2,8,367], index: 0, kind: input, shape index: {}]   ;;  %s3154_s1 = inlined_call_operand.hbm [shape: f32[367,1024], index: 1, kind: input, shape index: {}]   ;;  %s3155_s2 = inlined_call_operand.hbm [shape: f32[1,1024], index: 2, kind: input, shape index: {}]   ;;  %s3156_s3 = inlined_call_operand.hbm [shape: f32[2,8,16,128], index: 3, kind: output, shape index: {}]  }
   0x1   :  { %10 = vsyncpa [#allocation3 + $0x1], 0 }
   0x2   :  { %11 = vsyncpa [#allocation6], 0 }
   0x3   :  { %12 = vsyncpa [#allocation4], 0 }
   0x4   :  { %14 = vsyncpa [#allocation4 + $0x1], 0  ;;  %s2742_s12 = smov 0   ;;  %s2744_s13 = smov 0  }
   0x5   :  { %s2746_s14 = smov 0   ;;  %s2748_s15 = smov 0  }
   0x6 LB: > { %s2763_s16 = sadd.s32 4294967295, %s2709_s15   ;;  %s2393_s17 = sadd.s32 4294967294, %s2709_s15   ;;  %s2709_s15 = sphi %s2748_s15, %s3178_s15   ;;  %s2705_s14 = sphi %s2746_s14, %s3177_s14   ;;  %s2701_s13 = sphi %s2744_s13, %s3176_s13   ;;  %s2697_s12 = sphi %s2742_s12, %s3175_s12  }
   0x7   : > { %p40_p0 = scmp.ne.s32.totalorder %s2701_s13, %s2697_s12  ;;  %p3157_p1 = scmp.eq.s32.totalorder %s2763_s16, 0 }
   0x8   : > { %p112_p3 = scmp.eq.s32.totalorder %s2393_s17, 1  ;;  %p2394_p5 = scmp.ge.s32.totalorder %s2709_s15, 1 }
   0x9   : > { %p2772_p4 = por %p3157_p1, %p40_p0  ;;  %p119_p7 = scmp.lt.s32.totalorder %s2709_s15, 3 }
   0xa   : > { %p2777_p6 = por %p112_p3, %p40_p0  ;;  %s2711_s21 = smov [#allocation5]  }
   0xb   : > { %s3161_s18 = scalar_select %p2772_p4, 1, 0 }
   0xc   : > { %s3162_s19 = scalar_select %p2777_p6, 1, 0 }
   0xd   : > { %p2782_p8 = pnand %p2394_p5, %p119_p7  ;;  %s131_s22 = sshll.u32 %s2711_s21, 4  ;;  %s132_s22 = int_to_ptr.vmem [resolvable:$true] %s131_s22 }
   0xe   : > { %s2712_s24 = smov [#allocation7]   ;;  %s2572_s26 = scalar_lea.vmem %s132_s22, 47104 }
   0xf   : > { %s3163_s20 = scalar_select %p2782_p8, 1, 0 }
  0x10   : > { %p2450_p9 = pneg %p2782_p8  ;;  %s145_s25 = sshll.u32 %s2712_s24, 4  ;;  %s146_s25 = int_to_ptr.vmem [resolvable:$true] %s145_s25 }
  0x11   : > { %p2573_p13 = scmp.ne.s32.totalorder %s132_s22, %s2572_s26  ;;  %p2580_p5 = scmp.lt.s32.totalorder %s132_s22, %s132_s22 }
  0x12   : > { %p2791_p11 = pnand %p2450_p9, %p3157_p1  ;;  %p2581_p7 = scmp.lt.s32.totalorder %s2572_s26, %s2572_s26 }
  0x14   : > { %p2563_p12 = pneg %p2791_p11  ;;  %p2582_p10 = por %p2581_p7, %p2580_p5 }
  0x16   : > { %p2575_p0 = pnand %p2573_p13, %p2563_p12 }
  0x18   : > { %p2576_p3 = pneg %p2575_p0 }
  0x1a   : > { %p2583_p9 = pnand %p2582_p10, %p2576_p3 }
  0x1c   : > { %2586 = shalt.err (!%p2583_p9)
}
  0x1d   : > { %s2713_s27 = smov 1024   ;;  %s2714_s28 = smov 64  }
  0x1e   : > { %2453 = dma.hbm_to_vmem [thread:$0]  (!%p2791_p11), %s3154_s1, 47104, %s132_s22, [#allocation6], %s2713_s27, %s2713_s27, %s2714_s28  }
  0x1f   : > { %s2598_s4 = scalar_lea.vmem %s146_s25, 128  ;;  %p2606_p2 = scmp.lt.s32.totalorder %s146_s25, %s146_s25 }
  0x20   : > { %p2599_p1 = scmp.ne.s32.totalorder %s146_s25, %s2598_s4  ;;  %p2607_p6 = scmp.lt.s32.totalorder %s2598_s4, %s2598_s4 }
  0x22   : > { %p2601_p13 = pnand %p2599_p1, %p2563_p12  ;;  %p2608_p5 = por %p2607_p6, %p2606_p2 }
  0x24   : > { %p2602_p0 = pneg %p2601_p13 }
  0x26   : > { %p2609_p10 = pnand %p2608_p5, %p2602_p0 }
  0x28   : > { %2612 = shalt.err (!%p2609_p10)
}
  0x29   : > { %2456 = dma.hbm_to_vmem [thread:$0]  (!%p2791_p11), %s3155_s2, 128, %s146_s25, [#allocation6]  }
  0x2a   : > { %s2814_s7 = sadd.s32 1, %s2709_s15   ;;  %s27_s8 = sadd.s32 1, %s2705_s14 }
  0x2b   : > { %s24_s9 = ssub.s32 %s2709_s15, %s2814_s7  ;;  %p34_p1 = scmp.ne.s32.totalorder %s2705_s14, %s2701_s13 }
  0x2c   : > { %p25_p2 = scmp.eq.s32.totalorder %s24_s9, 0  ;;  %p35_p6 = scmp.eq.s32.totalorder %s2709_s15, 0 }
  0x2d   : > { %p3165_p12 = scmp.eq.s32.totalorder %s2763_s16, 1  ;;  %p2467_p7 = scmp.lt.s32.totalorder %s2709_s15, 2 }
  0x2e   : > { %s2830_s11 = scalar_select %p25_p2, %s2705_s14, %s27_s8  }
  0x2f   : > { %p2824_p3 = por %p3165_p12, %p34_p1  ;;  %p36_p9 = por %p35_p6, %p34_p1 }
  0x30   : > { %s156_s17 = sand.u32 1, %s2705_s14   ;;  %s2436_s22 = smul.u32 384, %s2709_s15 }
  0x31   : > { %s3166_s10 = scalar_select %p2824_p3, 1, 0 }
  0x32   : > { %s2435_s21 = smul.u32 24, %s156_s17  ;;  %p2834_p11 = pnand %p2467_p7, %p36_p9 }
  0x33   : > { %s2841_s26 = scalar_lea.hbm %s3153_s0, %s2436_s22  ;;  %s157_s29 = scalar_lea.sflag [#allocation3], %s156_s17 }
  0x34   : > { %s160_s27 = scalar_lea.vmem [#allocation2], %s2435_s21  ;;  %s2613_s30 = scalar_lea.hbm %s2841_s26, 384 }
  0x35   : > { %s168_s28 = sshll.u32 %s160_s27, 4  ;;  %p2614_p13 = scmp.ne.s32.totalorder %s2841_s26, %s2613_s30  ;;  %s169_s28 = int_to_ptr.vmem [resolvable:$true] %s168_s28 }
  0x36   : > { %p2615_p0 = pneg %p2834_p11  ;;  %s2618_s6 = scalar_lea.hbm %s3153_s0, 768 }
  0x37   : > { %p2619_p1 = scmp.lt.s32.totalorder %s2841_s26, %s3153_s0  ;;  %p2620_p2 = scmp.lt.s32.totalorder %s2618_s6, %s2613_s30 }
  0x38   : > { %p2616_p5 = pnand %p2615_p0, %p2614_p13 }
  0x39   : > { %p2621_p6 = por %p2620_p2, %p2619_p1 }
  0x3a   : > { %p2617_p10 = pneg %p2616_p5 }
  0x3c   : > { %p2622_p12 = pnand %p2621_p6, %p2617_p10 }
  0x3e   : > { %2625 = shalt.err (!%p2622_p12)
}
  0x3f   : > { %s2626_s21 = scalar_lea.vmem %s169_s28, 384  ;;  %s2715_s17 = smov [#allocation2]  }
  0x40   : > { %p2627_p7 = scmp.ne.s32.totalorder %s169_s28, %s2626_s21  ;;  %s2631_s22 = sshll.u32 %s2715_s17, 4  ;;  %s2632_s22 = int_to_ptr.vmem [resolvable:$false] %s2631_s22 }
  0x41   : > { %s2633_s24 = scalar_lea.vmem %s2632_s22, 768  ;;  %p2634_p13 = scmp.lt.s32.totalorder %s169_s28, %s2632_s22 }
  0x42   : > { %p2629_p9 = pnand %p2627_p7, %p2615_p0  ;;  %p2635_p5 = scmp.lt.s32.totalorder %s2633_s24, %s2626_s21 }
  0x44   : > { %p2630_p3 = pneg %p2629_p9  ;;  %p2636_p4 = por %p2635_p5, %p2634_p13 }
  0x46   : > { %p2637_p8 = pnand %p2636_p4, %p2630_p3 }
  0x48   : > { %2640 = shalt.err (!%p2637_p8)
}
  0x49   : > { %2460 = dma.hbm_to_vmem [thread:$0]  (!%p2834_p11), %s2841_s26, 384, %s169_s28, %s157_s29  }
  0x4a   : > { %p3168_p10 = scmp.ne.s32.totalorder %s3163_s20, 0 }
  0x4b   : > { %s2860_s25 = sand.u32 (!%p3168_p10), 1, %s2701_s13   ;;  %p3169_p0 = scmp.ne.s32.totalorder (!%p3168_p10), %s3161_s18, 0 }
  0x4c   : > { %177 = sbr.rel (%p3168_p10) target bundleno = 578 (0x242), region = 32  ;;  %s180_s30 = scalar_lea.sflag (!%p3168_p10), [#allocation3], %s2860_s25 }
  0x4d   : > { %s2437_s27 = smul.u32 (!%p3168_p10), 24, %s2860_s25 }
  0x4f   : > { %s2864_s4 = scalar_lea.vmem (!%p3168_p10), [#allocation2], %s2437_s27 }
  0x51   : > { %2684 = dma.done.wait (%p3169_p0), %s180_s30, 384  }
  0x52   : > { %2686 = vsyncadd (%p3169_p0), %s180_s30, 4294966912  ;;  %p3170_p4 = scmp.eq.s32.totalorder %s2763_s16, 0 }
  0x54   : > { %2688 = dma.done.wait (%p3170_p4), [#allocation6], 47232   ;;  %p3171_p8 = pmov %p3170_p4 }
  0x55   : > { %v2716_v0 = vmov 0.0   ;;  %vm631_vm0 = vcmask 1046528   ;;  %v338_v1 = vld [vmem:[#allocation5 + $0x3c8] sm:$0xff]  ;;  %v337_v3 = vld [vmem:[#allocation5 + $0x3c0] sm:$0xff]  ;;  %vm627_vm1 = vcmask 908288   ;;  %v340_v59 = vld [vmem:[#allocation5 + $0x3d8] sm:$0xff] }
  0x56   : > { %2690 = vsyncadd (%p3171_p8), [#allocation6], 4294920064  ;;  %791 = vmatprep.mubr.f32.mxu1 %v2716_v0  ;;  %v578_v2 = vld [vmem:[#allocation5 + $0xb48] sm:$0x7f]  ;;  %656 = vmatprep.subr.mxu0 %v338_v1  ;;  %v577_v4 = vld [vmem:[#allocation5 + $0xb40] sm:$0x7f] }
  0x57   : > { %2403 = vmatprep.subr.msk.mxu1 %vm631_vm0, %v578_v2  ;;  %v330_v5 = vld [vmem:[#allocation5 + $0x388] sm:$0xff]  ;;  %657 = vmatpush1.msra.mxu0 %v337_v3  ;;  %v329_v7 = vld [vmem:[#allocation5 + $0x380] sm:$0xff]  ;;  %v339_v61 = vld [vmem:[#allocation5 + $0x3d0] sm:$0xff]  ;;  %s2402_s18 = sshll.u32 %s2860_s25, 7  ;;  %s2434_s23 = sshll.u32 %s2763_s16, 11 }
  0x58   : > { %v570_v6 = vld [vmem:[#allocation5 + $0xb08] sm:$0xff]  ;;  %2404 = vmatpush1.msk.msra.mxu1 %vm631_vm0, %v577_v4  ;;  %v569_v8 = vld [vmem:[#allocation5 + $0xb00] sm:$0xff]  ;;  %658 = vmatprep.subr.mxu0 %v330_v5  ;;  %v332_v63 = vld [vmem:[#allocation5 + $0x398] sm:$0xff]  ;;  %s2965_s20 = scalar_lea.vmem [#allocation8], %s2402_s18  ;;  %s3106_s5 = scalar_lea.hbm %s3156_s3, %s2434_s23 }
  0x59   : > { %v322_v9 = vld [vmem:[#allocation5 + $0x348] sm:$0xff]  ;;  %733 = vmatprep.subr.mxu1 %v570_v6  ;;  %v321_v11 = vld [vmem:[#allocation5 + $0x340] sm:$0xff]  ;;  %659 = vmatpush1.msra.mxu0 %v329_v7  ;;  %v331_v2 = vld [vmem:[#allocation5 + $0x390] sm:$0xff]  ;;  %s2301_s26 = sshll.u32 %s2965_s20, 4  ;;  %s2288_s16 = scalar_lea.sflag [#allocation4], %s2860_s25  ;;  %s3108_s26 = int_to_ptr.vmem [resolvable:$true] %s2301_s26 }
  0x5a   : > { %v562_v10 = vld [vmem:[#allocation5 + $0xac8] sm:$0xff]  ;;  %v561_v12 = vld [vmem:[#allocation5 + $0xac0] sm:$0xff]  ;;  %734 = vmatpush1.msra.mxu1 %v569_v8  ;;  %660 = vmatprep.subr.mxu0 %v322_v9  ;;  %v324_v4 = vld [vmem:[#allocation5 + $0x358] sm:$0xff]  ;;  %s2641_s6 = scalar_lea.vmem %s3108_s26, 2048  ;;  %p3172_p11 = scmp.ne.s32.totalorder %s3166_s10, 0 }
  0x5b   : > { %v314_v13 = vld [vmem:[#allocation5 + $0x308] sm:$0xff]  ;;  %735 = vmatprep.subr.mxu1 %v562_v10  ;;  %v313_v15 = vld [vmem:[#allocation5 + $0x300] sm:$0xff]  ;;  %661 = vmatpush1.msra.mxu0 %v321_v11  ;;  %v323_v6 = vld [vmem:[#allocation5 + $0x350] sm:$0xff]  ;;  %p2642_p3 = scmp.ne.s32.totalorder %s3108_s26, %s2641_s6  ;;  %s2719_s8 = smov [#allocation8]  }
  0x5c   : > { %v554_v14 = vld [vmem:[#allocation5 + $0xa88] sm:$0xff]  ;;  %v553_v16 = vld [vmem:[#allocation5 + $0xa80] sm:$0xff]  ;;  %736 = vmatpush1.msra.mxu1 %v561_v12  ;;  %662 = vmatprep.subr.mxu0 %v314_v13  ;;  %v316_v8 = vld [vmem:[#allocation5 + $0x318] sm:$0xff]  ;;  %s2645_s9 = sshll.u32 %s2719_s8, 4  ;;  %s2646_s9 = int_to_ptr.vmem [resolvable:$false] %s2645_s9 }
  0x5d   : > { %v306_v17 = vld [vmem:[#allocation5 + $0x2c8] sm:$0xff]  ;;  %737 = vmatprep.subr.mxu1 %v554_v14  ;;  %v305_v19 = vld [vmem:[#allocation5 + $0x2c0] sm:$0xff]  ;;  %663 = vmatpush1.msra.mxu0 %v313_v15  ;;  %v315_v10 = vld [vmem:[#allocation5 + $0x310] sm:$0xff]  ;;  %p2643_p1 = pnand %p2642_p3, %p3172_p11  ;;  %s2647_s21 = scalar_lea.vmem %s2646_s9, 4096 }
  0x5e   : > { %v546_v18 = vld [vmem:[#allocation5 + $0xa48] sm:$0xff]  ;;  %v545_v20 = vld [vmem:[#allocation5 + $0xa40] sm:$0xff]  ;;  %738 = vmatpush1.msra.mxu1 %v553_v16  ;;  %664 = vmatprep.subr.mxu0 %v306_v17  ;;  %v308_v12 = vld [vmem:[#allocation5 + $0x2d8] sm:$0xff]  ;;  %p2648_p6 = scmp.lt.s32.totalorder %s3108_s26, %s2646_s9  ;;  %p2649_p12 = scmp.lt.s32.totalorder %s2647_s21, %s2641_s6 }
  0x5f   : > { %v298_v21 = vld [vmem:[#allocation5 + $0x288] sm:$0xff]  ;;  %739 = vmatprep.subr.mxu1 %v546_v18  ;;  %v297_v23 = vld [vmem:[#allocation5 + $0x280] sm:$0xff]  ;;  %665 = vmatpush1.msra.mxu0 %v305_v19  ;;  %v307_v14 = vld [vmem:[#allocation5 + $0x2d0] sm:$0xff]  ;;  %p2644_p2 = pneg %p2643_p1 }
  0x60   : > { %v538_v22 = vld [vmem:[#allocation5 + $0xa08] sm:$0xff]  ;;  %v537_v24 = vld [vmem:[#allocation5 + $0xa00] sm:$0xff]  ;;  %740 = vmatpush1.msra.mxu1 %v545_v20  ;;  %666 = vmatprep.subr.mxu0 %v298_v21  ;;  %v300_v16 = vld [vmem:[#allocation5 + $0x298] sm:$0xff]  ;;  %p2650_p7 = por %p2649_p12, %p2648_p6 }
  0x61   : > { %v290_v25 = vld [vmem:[#allocation5 + $0x248] sm:$0xff]  ;;  %741 = vmatprep.subr.mxu1 %v538_v22  ;;  %v289_v27 = vld [vmem:[#allocation5 + $0x240] sm:$0xff]  ;;  %667 = vmatpush1.msra.mxu0 %v297_v23  ;;  %v299_v18 = vld [vmem:[#allocation5 + $0x290] sm:$0xff] }
  0x62   : > { %v530_v26 = vld [vmem:[#allocation5 + $0x9c8] sm:$0xff]  ;;  %v529_v28 = vld [vmem:[#allocation5 + $0x9c0] sm:$0xff]  ;;  %742 = vmatpush1.msra.mxu1 %v537_v24  ;;  %668 = vmatprep.subr.mxu0 %v290_v25  ;;  %v292_v20 = vld [vmem:[#allocation5 + $0x258] sm:$0xff]  ;;  %p2651_p9 = pnand %p2650_p7, %p2644_p2 }
  0x63   : > { %v282_v29 = vld [vmem:[#allocation5 + $0x208] sm:$0xff]  ;;  %743 = vmatprep.subr.mxu1 %v530_v26  ;;  %v281_v31 = vld [vmem:[#allocation5 + $0x200] sm:$0xff]  ;;  %669 = vmatpush1.msra.mxu0 %v289_v27  ;;  %v291_v22 = vld [vmem:[#allocation5 + $0x250] sm:$0xff] }
  0x64   : > { %v522_v30 = vld [vmem:[#allocation5 + $0x988] sm:$0xff]  ;;  %v521_v32 = vld [vmem:[#allocation5 + $0x980] sm:$0xff]  ;;  %744 = vmatpush1.msra.mxu1 %v529_v28  ;;  %670 = vmatprep.subr.mxu0 %v282_v29  ;;  %v284_v24 = vld [vmem:[#allocation5 + $0x218] sm:$0xff] }
  0x65   : > { %v274_v33 = vld [vmem:[#allocation5 + $0x1c8] sm:$0xff]  ;;  %745 = vmatprep.subr.mxu1 %v522_v30  ;;  %v273_v35 = vld [vmem:[#allocation5 + $0x1c0] sm:$0xff]  ;;  %671 = vmatpush1.msra.mxu0 %v281_v31  ;;  %v283_v26 = vld [vmem:[#allocation5 + $0x210] sm:$0xff] }
  0x66   : > { %v514_v34 = vld [vmem:[#allocation5 + $0x948] sm:$0xff]  ;;  %v513_v36 = vld [vmem:[#allocation5 + $0x940] sm:$0xff]  ;;  %746 = vmatpush1.msra.mxu1 %v521_v32  ;;  %672 = vmatprep.subr.mxu0 %v274_v33  ;;  %v276_v28 = vld [vmem:[#allocation5 + $0x1d8] sm:$0xff] }
  0x67   : > { %v266_v37 = vld [vmem:[#allocation5 + $0x188] sm:$0xff]  ;;  %747 = vmatprep.subr.mxu1 %v514_v34  ;;  %v265_v39 = vld [vmem:[#allocation5 + $0x180] sm:$0xff]  ;;  %673 = vmatpush1.msra.mxu0 %v273_v35  ;;  %v275_v30 = vld [vmem:[#allocation5 + $0x1d0] sm:$0xff] }
  0x68   : > { %v506_v38 = vld [vmem:[#allocation5 + $0x908] sm:$0xff]  ;;  %v505_v40 = vld [vmem:[#allocation5 + $0x900] sm:$0xff]  ;;  %748 = vmatpush1.msra.mxu1 %v513_v36  ;;  %674 = vmatprep.subr.mxu0 %v266_v37  ;;  %v268_v32 = vld [vmem:[#allocation5 + $0x198] sm:$0xff] }
  0x69   : > { %v258_v41 = vld [vmem:[#allocation5 + $0x148] sm:$0xff]  ;;  %749 = vmatprep.subr.mxu1 %v506_v38  ;;  %v257_v43 = vld [vmem:[#allocation5 + $0x140] sm:$0xff]  ;;  %675 = vmatpush1.msra.mxu0 %v265_v39  ;;  %v267_v34 = vld [vmem:[#allocation5 + $0x190] sm:$0xff] }
  0x6a   : > { %v498_v42 = vld [vmem:[#allocation5 + $0x8c8] sm:$0xff]  ;;  %v497_v44 = vld [vmem:[#allocation5 + $0x8c0] sm:$0xff]  ;;  %750 = vmatpush1.msra.mxu1 %v505_v40  ;;  %676 = vmatprep.subr.mxu0 %v258_v41  ;;  %v260_v36 = vld [vmem:[#allocation5 + $0x158] sm:$0xff] }
  0x6b   : > { %v250_v45 = vld [vmem:[#allocation5 + $0x108] sm:$0xff]  ;;  %751 = vmatprep.subr.mxu1 %v498_v42  ;;  %v249_v47 = vld [vmem:[#allocation5 + $0x100] sm:$0xff]  ;;  %677 = vmatpush1.msra.mxu0 %v257_v43  ;;  %v259_v38 = vld [vmem:[#allocation5 + $0x150] sm:$0xff] }
  0x6c   : > { %v490_v46 = vld [vmem:[#allocation5 + $0x888] sm:$0xff]  ;;  %v489_v48 = vld [vmem:[#allocation5 + $0x880] sm:$0xff]  ;;  %752 = vmatpush1.msra.mxu1 %v497_v44  ;;  %678 = vmatprep.subr.mxu0 %v250_v45  ;;  %v252_v40 = vld [vmem:[#allocation5 + $0x118] sm:$0xff] }
  0x6d   : > { %v242_v49 = vld [vmem:[#allocation5 + $0xc8] sm:$0xff]  ;;  %753 = vmatprep.subr.mxu1 %v490_v46  ;;  %v241_v51 = vld [vmem:[#allocation5 + $0xc0] sm:$0xff]  ;;  %679 = vmatpush1.msra.mxu0 %v249_v47  ;;  %v251_v42 = vld [vmem:[#allocation5 + $0x110] sm:$0xff] }
  0x6e   : > { %v482_v50 = vld [vmem:[#allocation5 + $0x848] sm:$0xff]  ;;  %v481_v52 = vld [vmem:[#allocation5 + $0x840] sm:$0xff]  ;;  %754 = vmatpush1.msra.mxu1 %v489_v48  ;;  %680 = vmatprep.subr.mxu0 %v242_v49  ;;  %v244_v44 = vld [vmem:[#allocation5 + $0xd8] sm:$0xff] }
  0x6f   : > { %v234_v53 = vld [vmem:[#allocation5 + $0x88] sm:$0xff]  ;;  %755 = vmatprep.subr.mxu1 %v482_v50  ;;  %v233_v55 = vld [vmem:[#allocation5 + $0x80] sm:$0xff]  ;;  %681 = vmatpush1.msra.mxu0 %v241_v51  ;;  %v243_v46 = vld [vmem:[#allocation5 + $0xd0] sm:$0xff] }
  0x70   : > { %v474_v54 = vld [vmem:[#allocation5 + $0x808] sm:$0xff]  ;;  %v473_v56 = vld [vmem:[#allocation5 + $0x800] sm:$0xff]  ;;  %756 = vmatpush1.msra.mxu1 %v481_v52  ;;  %682 = vmatprep.subr.mxu0 %v234_v53  ;;  %v236_v48 = vld [vmem:[#allocation5 + $0x98] sm:$0xff] }
  0x71   : > { %v226_v57 = vld [vmem:[#allocation5 + $0x48] sm:$0xff]  ;;  %v2878_v58 = vld [vmem:[%s2864_s4 + $0x10] sm:$0xff]  ;;  %757 = vmatprep.subr.mxu1 %v474_v54  ;;  %683 = vmatpush1.msra.mxu0 %v233_v55  ;;  %v235_v50 = vld [vmem:[#allocation5 + $0x90] sm:$0xff] }
  0x72   : > { %v225_v60 = vld [vmem:[#allocation5 + $0x40] sm:$0xff]  ;;  %758 = vmatpush1.msra.mxu1 %v473_v56  ;;  %v218_v62 = vld [vmem:[#allocation5 + $0x8] sm:$0xff]  ;;  %684 = vmatprep.subr.mxu0 %v226_v57  ;;  %v228_v52 = vld [vmem:[#allocation5 + $0x58] sm:$0xff] }
  0x73   : > { %2405 = vmatmul.mubr.msk.f32.vlgmr.msra.gmra.mxu1 %vm627_vm1, %v2878_v58  ;;  %v217_v1 = vld [vmem:[#allocation5] sm:$0xff]  ;;  %798 = vmatprep.subr.mxu1 %v340_v59  ;;  %v466_v3 = vld [vmem:[#allocation5 + $0x7c8] sm:$0xff]  ;;  %v227_v54 = vld [vmem:[#allocation5 + $0x50] sm:$0xff] }
  0x74   : > { %685 = vmatpush1.msra.mxu0 %v225_v60  ;;  %799 = vmatpush1.msra.mxu1 %v339_v61  ;;  %v465_v5 = vld [vmem:[#allocation5 + $0x7c0] sm:$0xff]  ;;  %v458_v7 = vld [vmem:[#allocation5 + $0x788] sm:$0xff]  ;;  %v220_v56 = vld [vmem:[#allocation5 + $0x18] sm:$0xff] }
  0x75   : > { %686 = vmatprep.subr.mxu0 %v218_v62  ;;  %800 = vmatprep.subr.mxu1 %v332_v63  ;;  %v457_v9 = vld [vmem:[#allocation5 + $0x780] sm:$0xff]  ;;  %v450_v11 = vld [vmem:[#allocation5 + $0x748] sm:$0xff]  ;;  %v219_v59 = vld [vmem:[#allocation5 + $0x10] sm:$0xff] }
  0x76   : > { %687 = vmatpush1.msra.mxu0 %v217_v1  ;;  %801 = vmatpush1.msra.mxu1 %v331_v2  ;;  %v449_v13 = vld [vmem:[#allocation5 + $0x740] sm:$0xff]  ;;  %v442_v15 = vld [vmem:[#allocation5 + $0x708] sm:$0xff]  ;;  %v468_v61 = vld [vmem:[#allocation5 + $0x7d8] sm:$0xff] }
  0x77   : > { %688 = vmatprep.subr.mxu0 %v466_v3  ;;  %802 = vmatprep.subr.mxu1 %v324_v4  ;;  %v441_v17 = vld [vmem:[#allocation5 + $0x700] sm:$0xff]  ;;  %v434_v19 = vld [vmem:[#allocation5 + $0x6c8] sm:$0xff]  ;;  %v467_v63 = vld [vmem:[#allocation5 + $0x7d0] sm:$0xff] }
  0x78   : > { %689 = vmatpush2.msra.mxu0 %v465_v5  ;;  %803 = vmatpush1.msra.mxu1 %v323_v6  ;;  %v433_v21 = vld [vmem:[#allocation5 + $0x6c0] sm:$0xff]  ;;  %v426_v23 = vld [vmem:[#allocation5 + $0x688] sm:$0xff]  ;;  %v460_v2 = vld [vmem:[#allocation5 + $0x798] sm:$0xff] }
  0x79   : > { %690 = vmatprep.subr.mxu0 %v458_v7  ;;  %804 = vmatprep.subr.mxu1 %v316_v8  ;;  %v425_v25 = vld [vmem:[#allocation5 + $0x680] sm:$0xff]  ;;  %v418_v27 = vld [vmem:[#allocation5 + $0x648] sm:$0xff]  ;;  %v2883_v4 = vld [vmem:[%s2864_s4 + $0x8] sm:$0xff] }
  0x7a   : > { %691 = vmatpush2.msra.mxu0 %v457_v9  ;;  %805 = vmatpush1.msra.mxu1 %v315_v10  ;;  %v417_v29 = vld [vmem:[#allocation5 + $0x640] sm:$0xff]  ;;  %v410_v31 = vld [vmem:[#allocation5 + $0x608] sm:$0xff]  ;;  %v459_v5 = vld [vmem:[#allocation5 + $0x790] sm:$0xff] }
  0x7b   : > { %692 = vmatprep.subr.mxu0 %v450_v11  ;;  %806 = vmatprep.subr.mxu1 %v308_v12  ;;  %v409_v33 = vld [vmem:[#allocation5 + $0x600] sm:$0xff]  ;;  %v402_v35 = vld [vmem:[#allocation5 + $0x5c8] sm:$0xff]  ;;  %v452_v7 = vld [vmem:[#allocation5 + $0x758] sm:$0xff] }
  0x7c   : > { %693 = vmatpush2.msra.mxu0 %v449_v13  ;;  %807 = vmatpush1.msra.mxu1 %v307_v14  ;;  %v401_v37 = vld [vmem:[#allocation5 + $0x5c0] sm:$0xff]  ;;  %v394_v39 = vld [vmem:[#allocation5 + $0x588] sm:$0xff]  ;;  %v580_v8 = vld [vmem:[#allocation5 + $0xb58] sm:$0x7f] }
  0x7d   : > { %694 = vmatprep.subr.mxu0 %v442_v15  ;;  %808 = vmatprep.subr.mxu1 %v300_v16  ;;  %v393_v41 = vld [vmem:[#allocation5 + $0x580] sm:$0xff]  ;;  %v386_v43 = vld [vmem:[#allocation5 + $0x548] sm:$0xff]  ;;  %v451_v9 = vld [vmem:[#allocation5 + $0x750] sm:$0xff] }
  0x7e   : > { %695 = vmatpush2.msra.mxu0 %v441_v17  ;;  %809 = vmatpush1.msra.mxu1 %v299_v18  ;;  %v385_v45 = vld [vmem:[#allocation5 + $0x540] sm:$0xff]  ;;  %v378_v47 = vld [vmem:[#allocation5 + $0x508] sm:$0xff]  ;;  %v579_v10 = vld [vmem:[#allocation5 + $0xb50] sm:$0x7f] }
  0x7f   : > { %696 = vmatprep.subr.mxu0 %v434_v19  ;;  %810 = vmatprep.subr.mxu1 %v292_v20  ;;  %v377_v49 = vld [vmem:[#allocation5 + $0x500] sm:$0xff]  ;;  %v370_v51 = vld [vmem:[#allocation5 + $0x4c8] sm:$0xff]  ;;  %v444_v11 = vld [vmem:[#allocation5 + $0x718] sm:$0xff] }
  0x80   : > { %697 = vmatpush2.msra.mxu0 %v433_v21  ;;  %811 = vmatpush1.msra.mxu1 %v291_v22  ;;  %v369_v53 = vld [vmem:[#allocation5 + $0x4c0] sm:$0xff]  ;;  %v362_v55 = vld [vmem:[#allocation5 + $0x488] sm:$0xff]  ;;  %v572_v12 = vld [vmem:[#allocation5 + $0xb18] sm:$0xff] }
  0x81   : > { %698 = vmatprep.subr.mxu0 %v426_v23  ;;  %812 = vmatprep.subr.mxu1 %v284_v24  ;;  %v361_v57 = vld [vmem:[#allocation5 + $0x480] sm:$0xff]  ;;  %v354_v60 = vld [vmem:[#allocation5 + $0x448] sm:$0xff]  ;;  %v443_v13 = vld [vmem:[#allocation5 + $0x710] sm:$0xff] }
  0x82   : > { %699 = vmatpush2.msra.mxu0 %v425_v25  ;;  %813 = vmatpush1.msra.mxu1 %v283_v26  ;;  %v353_v62 = vld [vmem:[#allocation5 + $0x440] sm:$0xff]  ;;  %v346_v1 = vld [vmem:[#allocation5 + $0x408] sm:$0xff]  ;;  %v571_v14 = vld [vmem:[#allocation5 + $0xb10] sm:$0xff] }
  0x83   : > { %700 = vmatprep.subr.mxu0 %v418_v27  ;;  %814 = vmatprep.subr.mxu1 %v276_v28  ;;  %v345_v3 = vld [vmem:[#allocation5 + $0x400] sm:$0xff]  ;;  %v2886_v6 = vld [vmem:[%s2864_s4] sm:$0xff]  ;;  %v436_v15 = vld [vmem:[#allocation5 + $0x6d8] sm:$0xff] }
  0x84   : > { %701 = vmatpush2.msra.mxu0 %v417_v29  ;;  %815 = vmatpush1.msra.mxu1 %v275_v30  ;;  %v564_v16 = vld [vmem:[#allocation5 + $0xad8] sm:$0xff]  ;;  %v435_v17 = vld [vmem:[#allocation5 + $0x6d0] sm:$0xff] }
  0x85   : > { %702 = vmatprep.subr.mxu0 %v410_v31  ;;  %816 = vmatprep.subr.mxu1 %v268_v32  ;;  %v563_v18 = vld [vmem:[#allocation5 + $0xad0] sm:$0xff]  ;;  %v428_v19 = vld [vmem:[#allocation5 + $0x698] sm:$0xff] }
  0x86   : > { %703 = vmatpush2.msra.mxu0 %v409_v33  ;;  %817 = vmatpush1.msra.mxu1 %v267_v34  ;;  %v556_v20 = vld [vmem:[#allocation5 + $0xa98] sm:$0xff]  ;;  %v427_v21 = vld [vmem:[#allocation5 + $0x690] sm:$0xff] }
  0x87   : > { %704 = vmatprep.subr.mxu0 %v402_v35  ;;  %818 = vmatprep.subr.mxu1 %v260_v36  ;;  %v555_v22 = vld [vmem:[#allocation5 + $0xa90] sm:$0xff]  ;;  %v420_v23 = vld [vmem:[#allocation5 + $0x658] sm:$0xff] }
  0x88   : > { %705 = vmatpush2.msra.mxu0 %v401_v37  ;;  %819 = vmatpush1.msra.mxu1 %v259_v38  ;;  %v548_v24 = vld [vmem:[#allocation5 + $0xa58] sm:$0xff]  ;;  %v419_v25 = vld [vmem:[#allocation5 + $0x650] sm:$0xff] }
  0x89   : > { %706 = vmatprep.subr.mxu0 %v394_v39  ;;  %820 = vmatprep.subr.mxu1 %v252_v40  ;;  %v547_v26 = vld [vmem:[#allocation5 + $0xa50] sm:$0xff]  ;;  %v412_v27 = vld [vmem:[#allocation5 + $0x618] sm:$0xff] }
  0x8a   : > { %707 = vmatpush2.msra.mxu0 %v393_v41  ;;  %821 = vmatpush1.msra.mxu1 %v251_v42  ;;  %v540_v28 = vld [vmem:[#allocation5 + $0xa18] sm:$0xff]  ;;  %v411_v29 = vld [vmem:[#allocation5 + $0x610] sm:$0xff] }
  0x8b   : > { %708 = vmatprep.subr.mxu0 %v386_v43  ;;  %822 = vmatprep.subr.mxu1 %v244_v44  ;;  %v539_v30 = vld [vmem:[#allocation5 + $0xa10] sm:$0xff]  ;;  %v404_v31 = vld [vmem:[#allocation5 + $0x5d8] sm:$0xff] }
  0x8c   : > { %709 = vmatpush2.msra.mxu0 %v385_v45  ;;  %823 = vmatpush1.msra.mxu1 %v243_v46  ;;  %v532_v32 = vld [vmem:[#allocation5 + $0x9d8] sm:$0xff]  ;;  %v403_v33 = vld [vmem:[#allocation5 + $0x5d0] sm:$0xff] }
  0x8d   : > { %710 = vmatprep.subr.mxu0 %v378_v47  ;;  %824 = vmatprep.subr.mxu1 %v236_v48  ;;  %v531_v34 = vld [vmem:[#allocation5 + $0x9d0] sm:$0xff]  ;;  %v396_v35 = vld [vmem:[#allocation5 + $0x598] sm:$0xff] }
  0x8e   : > { %711 = vmatpush2.msra.mxu0 %v377_v49  ;;  %825 = vmatpush1.msra.mxu1 %v235_v50  ;;  %v524_v36 = vld [vmem:[#allocation5 + $0x998] sm:$0xff]  ;;  %v395_v37 = vld [vmem:[#allocation5 + $0x590] sm:$0xff] }
  0x8f   : > { %712 = vmatprep.subr.mxu0 %v370_v51  ;;  %826 = vmatprep.subr.mxu1 %v228_v52  ;;  %v523_v38 = vld [vmem:[#allocation5 + $0x990] sm:$0xff]  ;;  %v388_v39 = vld [vmem:[#allocation5 + $0x558] sm:$0xff] }
  0x90   : > { %713 = vmatpush2.msra.mxu0 %v369_v53  ;;  %827 = vmatpush1.msra.mxu1 %v227_v54  ;;  %v516_v40 = vld [vmem:[#allocation5 + $0x958] sm:$0xff]  ;;  %v387_v41 = vld [vmem:[#allocation5 + $0x550] sm:$0xff] }
  0x91   : > { %714 = vmatprep.subr.mxu0 %v362_v55  ;;  %828 = vmatprep.subr.mxu1 %v220_v56  ;;  %v515_v42 = vld [vmem:[#allocation5 + $0x950] sm:$0xff]  ;;  %v380_v43 = vld [vmem:[#allocation5 + $0x518] sm:$0xff] }
  0x92   : > { %715 = vmatpush2.msra.mxu0 %v361_v57  ;;  %829 = vmatpush1.msra.mxu1 %v219_v59  ;;  %v508_v44 = vld [vmem:[#allocation5 + $0x918] sm:$0xff]  ;;  %v379_v45 = vld [vmem:[#allocation5 + $0x510] sm:$0xff] }
  0x93   : > { %716 = vmatprep.subr.mxu0 %v354_v60  ;;  %830 = vmatprep.subr.mxu1 %v468_v61  ;;  %v507_v46 = vld [vmem:[#allocation5 + $0x910] sm:$0xff]  ;;  %v372_v47 = vld [vmem:[#allocation5 + $0x4d8] sm:$0xff] }
  0x94   : > { %717 = vmatpush2.msra.mxu0 %v353_v62  ;;  %831 = vmatpush2.msra.mxu1 %v467_v63  ;;  %v500_v48 = vld [vmem:[#allocation5 + $0x8d8] sm:$0xff]  ;;  %v371_v49 = vld [vmem:[#allocation5 + $0x4d0] sm:$0xff] }
  0x95   : > { %718 = vmatprep.subr.mxu0 %v346_v1  ;;  %832 = vmatprep.subr.mxu1 %v460_v2  ;;  %v499_v50 = vld [vmem:[#allocation5 + $0x8d0] sm:$0xff]  ;;  %v364_v51 = vld [vmem:[#allocation5 + $0x498] sm:$0xff]  ;;  %v342_v1 = vld [vmem:[#allocation5 + $0x3e8] sm:$0xff] }
  0x96   : > { %719 = vmatpush2.msra.mxu0 %v345_v3  ;;  %720 = vmatprep.mubr.f32.mxu0 %v2883_v4  ;;  %v492_v52 = vld [vmem:[#allocation5 + $0x898] sm:$0xff]  ;;  %v363_v53 = vld [vmem:[#allocation5 + $0x490] sm:$0xff]  ;;  %v582_v2 = vld [vmem:[#allocation5 + $0xb68] sm:$0x7f] }
  0x97   : > { %833 = vmatpush2.msra.mxu1 %v459_v5  ;;  %721 = vmatmul.mubr.f32.vlgmr.msra.gmra.mxu0 %v2886_v6  ;;  %v491_v54 = vld [vmem:[#allocation5 + $0x890] sm:$0xff]  ;;  %v356_v55 = vld [vmem:[#allocation5 + $0x458] sm:$0xff]  ;;  %v581_v3 = vld [vmem:[#allocation5 + $0xb60] sm:$0x7f] }
  0x98   : > { %834 = vmatprep.subr.mxu1 %v452_v7  ;;  %2406 = vmatprep.subr.msk.mxu0 %vm631_vm0, %v580_v8  ;;  %v484_v56 = vld [vmem:[#allocation5 + $0x858] sm:$0xff]  ;;  %v355_v57 = vld [vmem:[#allocation5 + $0x450] sm:$0xff]  ;;  %v341_v5 = vld [vmem:[#allocation5 + $0x3e0] sm:$0xff] }
  0x99   : > { %835 = vmatpush2.msra.mxu1 %v451_v9  ;;  %2407 = vmatpush1.msk.msra.mxu0 %vm631_vm0, %v579_v10  ;;  %v483_v59 = vld [vmem:[#allocation5 + $0x850] sm:$0xff]  ;;  %v348_v60 = vld [vmem:[#allocation5 + $0x418] sm:$0xff]  ;;  %v574_v7 = vld [vmem:[#allocation5 + $0xb28] sm:$0xff] }
  0x9a   : > { %836 = vmatprep.subr.mxu1 %v444_v11  ;;  %875 = vmatprep.subr.mxu0 %v572_v12  ;;  %v476_v61 = vld [vmem:[#allocation5 + $0x818] sm:$0xff]  ;;  %v347_v62 = vld [vmem:[#allocation5 + $0x410] sm:$0xff]  ;;  %v334_v8 = vld [vmem:[#allocation5 + $0x3a8] sm:$0xff] }
  0x9b   : > { %837 = vmatpush2.msra.mxu1 %v443_v13  ;;  %876 = vmatpush1.msra.mxu0 %v571_v14  ;;  %v475_v63 = vld [vmem:[#allocation5 + $0x810] sm:$0xff]  ;;  %v573_v9 = vld [vmem:[#allocation5 + $0xb20] sm:$0xff]  ;;  %v566_v11 = vld [vmem:[#allocation5 + $0xae8] sm:$0xff] }
  0x9c   : > { %838 = vmatprep.subr.mxu1 %v436_v15  ;;  %877 = vmatprep.subr.mxu0 %v564_v16  ;;  %v333_v10 = vld [vmem:[#allocation5 + $0x3a0] sm:$0xff]  ;;  %v326_v12 = vld [vmem:[#allocation5 + $0x368] sm:$0xff] }
  0x9d   : > { %839 = vmatpush2.msra.mxu1 %v435_v17  ;;  %878 = vmatpush1.msra.mxu0 %v563_v18  ;;  %v565_v13 = vld [vmem:[#allocation5 + $0xae0] sm:$0xff]  ;;  %v558_v15 = vld [vmem:[#allocation5 + $0xaa8] sm:$0xff] }
  0x9e   : > { %840 = vmatprep.subr.mxu1 %v428_v19  ;;  %879 = vmatprep.subr.mxu0 %v556_v20  ;;  %v325_v14 = vld [vmem:[#allocation5 + $0x360] sm:$0xff]  ;;  %v318_v16 = vld [vmem:[#allocation5 + $0x328] sm:$0xff] }
  0x9f   : > { %841 = vmatpush2.msra.mxu1 %v427_v21  ;;  %880 = vmatpush1.msra.mxu0 %v555_v22  ;;  %v557_v17 = vld [vmem:[#allocation5 + $0xaa0] sm:$0xff]  ;;  %v550_v19 = vld [vmem:[#allocation5 + $0xa68] sm:$0xff] }
  0xa0   : > { %842 = vmatprep.subr.mxu1 %v420_v23  ;;  %881 = vmatprep.subr.mxu0 %v548_v24  ;;  %v317_v18 = vld [vmem:[#allocation5 + $0x320] sm:$0xff]  ;;  %v310_v20 = vld [vmem:[#allocation5 + $0x2e8] sm:$0xff] }
  0xa1   : > { %843 = vmatpush2.msra.mxu1 %v419_v25  ;;  %882 = vmatpush1.msra.mxu0 %v547_v26  ;;  %v549_v21 = vld [vmem:[#allocation5 + $0xa60] sm:$0xff]  ;;  %v542_v23 = vld [vmem:[#allocation5 + $0xa28] sm:$0xff] }
  0xa2   : > { %844 = vmatprep.subr.mxu1 %v412_v27  ;;  %883 = vmatprep.subr.mxu0 %v540_v28  ;;  %v309_v22 = vld [vmem:[#allocation5 + $0x2e0] sm:$0xff]  ;;  %v302_v24 = vld [vmem:[#allocation5 + $0x2a8] sm:$0xff] }
  0xa3   : > { %845 = vmatpush2.msra.mxu1 %v411_v29  ;;  %884 = vmatpush1.msra.mxu0 %v539_v30  ;;  %v541_v25 = vld [vmem:[#allocation5 + $0xa20] sm:$0xff]  ;;  %v534_v27 = vld [vmem:[#allocation5 + $0x9e8] sm:$0xff] }
  0xa4   : > { %846 = vmatprep.subr.mxu1 %v404_v31  ;;  %885 = vmatprep.subr.mxu0 %v532_v32  ;;  %v301_v26 = vld [vmem:[#allocation5 + $0x2a0] sm:$0xff]  ;;  %v294_v28 = vld [vmem:[#allocation5 + $0x268] sm:$0xff] }
  0xa5   : > { %847 = vmatpush2.msra.mxu1 %v403_v33  ;;  %886 = vmatpush1.msra.mxu0 %v531_v34  ;;  %v533_v29 = vld [vmem:[#allocation5 + $0x9e0] sm:$0xff]  ;;  %v526_v31 = vld [vmem:[#allocation5 + $0x9a8] sm:$0xff] }
  0xa6   : > { %848 = vmatprep.subr.mxu1 %v396_v35  ;;  %887 = vmatprep.subr.mxu0 %v524_v36  ;;  %v293_v30 = vld [vmem:[#allocation5 + $0x260] sm:$0xff]  ;;  %v286_v32 = vld [vmem:[#allocation5 + $0x228] sm:$0xff] }
  0xa7   : > { %849 = vmatpush2.msra.mxu1 %v395_v37  ;;  %888 = vmatpush1.msra.mxu0 %v523_v38  ;;  %v525_v33 = vld [vmem:[#allocation5 + $0x9a0] sm:$0xff]  ;;  %v518_v35 = vld [vmem:[#allocation5 + $0x968] sm:$0xff] }
  0xa8   : > { %850 = vmatprep.subr.mxu1 %v388_v39  ;;  %889 = vmatprep.subr.mxu0 %v516_v40  ;;  %v285_v34 = vld [vmem:[#allocation5 + $0x220] sm:$0xff]  ;;  %v278_v36 = vld [vmem:[#allocation5 + $0x1e8] sm:$0xff] }
  0xa9   : > { %851 = vmatpush2.msra.mxu1 %v387_v41  ;;  %890 = vmatpush1.msra.mxu0 %v515_v42  ;;  %v517_v37 = vld [vmem:[#allocation5 + $0x960] sm:$0xff]  ;;  %v510_v39 = vld [vmem:[#allocation5 + $0x928] sm:$0xff] }
  0xaa   : > { %852 = vmatprep.subr.mxu1 %v380_v43  ;;  %891 = vmatprep.subr.mxu0 %v508_v44  ;;  %v277_v38 = vld [vmem:[#allocation5 + $0x1e0] sm:$0xff]  ;;  %v270_v40 = vld [vmem:[#allocation5 + $0x1a8] sm:$0xff] }
  0xab   : > { %853 = vmatpush2.msra.mxu1 %v379_v45  ;;  %892 = vmatpush1.msra.mxu0 %v507_v46  ;;  %v509_v41 = vld [vmem:[#allocation5 + $0x920] sm:$0xff]  ;;  %v502_v43 = vld [vmem:[#allocation5 + $0x8e8] sm:$0xff] }
  0xac   : > { %854 = vmatprep.subr.mxu1 %v372_v47  ;;  %893 = vmatprep.subr.mxu0 %v500_v48  ;;  %v269_v42 = vld [vmem:[#allocation5 + $0x1a0] sm:$0xff]  ;;  %v262_v44 = vld [vmem:[#allocation5 + $0x168] sm:$0xff] }
  0xad   : > { %855 = vmatpush2.msra.mxu1 %v371_v49  ;;  %894 = vmatpush1.msra.mxu0 %v499_v50  ;;  %v501_v45 = vld [vmem:[#allocation5 + $0x8e0] sm:$0xff]  ;;  %v494_v47 = vld [vmem:[#allocation5 + $0x8a8] sm:$0xff] }
  0xae   : > { %856 = vmatprep.subr.mxu1 %v364_v51  ;;  %895 = vmatprep.subr.mxu0 %v492_v52  ;;  %v261_v46 = vld [vmem:[#allocation5 + $0x160] sm:$0xff]  ;;  %v254_v48 = vld [vmem:[#allocation5 + $0x128] sm:$0xff] }
  0xaf   : > { %857 = vmatpush2.msra.mxu1 %v363_v53  ;;  %896 = vmatpush1.msra.mxu0 %v491_v54  ;;  %v493_v49 = vld [vmem:[#allocation5 + $0x8a0] sm:$0xff]  ;;  %v486_v51 = vld [vmem:[#allocation5 + $0x868] sm:$0xff] }
  0xb0   : > { %858 = vmatprep.subr.mxu1 %v356_v55  ;;  %897 = vmatprep.subr.mxu0 %v484_v56  ;;  %v253_v50 = vld [vmem:[#allocation5 + $0x120] sm:$0xff]  ;;  %v246_v52 = vld [vmem:[#allocation5 + $0xe8] sm:$0xff] }
  0xb1   : > { %859 = vmatpush2.msra.mxu1 %v355_v57  ;;  %898 = vmatpush1.msra.mxu0 %v483_v59  ;;  %v485_v53 = vld [vmem:[#allocation5 + $0x860] sm:$0xff]  ;;  %v478_v55 = vld [vmem:[#allocation5 + $0x828] sm:$0xff] }
  0xb2   : > { %860 = vmatprep.subr.mxu1 %v348_v60  ;;  %899 = vmatprep.subr.mxu0 %v476_v61  ;;  %v245_v54 = vld [vmem:[#allocation5 + $0xe0] sm:$0xff]  ;;  %v238_v56 = vld [vmem:[#allocation5 + $0xa8] sm:$0xff]  ;;  %v344_v61 = vld [vmem:[#allocation5 + $0x3f8] sm:$0xff] }
  0xb3   : > { %861 = vmatpush2.msra.mxu1 %v347_v62  ;;  %862 = vmatprep.mubr.f32.mxu1 %v2883_v4  ;;  %v477_v57 = vld [vmem:[#allocation5 + $0x820] sm:$0xff]  ;;  %v230_v60 = vld [vmem:[#allocation5 + $0x68] sm:$0xff] }
  0xb4   : > { %900 = vmatpush1.msra.mxu0 %v475_v63  ;;  %863 = vmatmul.mubr.f32.vlgmr.msra.gmra.mxu1 %v2886_v6  ;;  %v237_v59 = vld [vmem:[#allocation5 + $0xa0] sm:$0xff]  ;;  %v343_v63 = vld [vmem:[#allocation5 + $0x3f0] sm:$0xff] }
  0xb5   : > { %933 = vmatprep.mubr.f32.mxu0 %v2716_v0  ;;  %940 = vmatprep.subr.mxu0 %v342_v1  ;;  %v229_v62 = vld [vmem:[#allocation5 + $0x60] sm:$0xff]  ;;  %v222_v1 = vld [vmem:[#allocation5 + $0x28] sm:$0xff] }
  0xb6   : > { %2409 = vmatprep.subr.msk.mxu1 %vm631_vm0, %v582_v2  ;;  %2408 = vmatmul.mubr.msk.f32.vlgmr.msra.gmra.mxu0 %vm627_vm1, %v2878_v58  ;;  %v336_v2 = vld [vmem:[#allocation5 + $0x3b8] sm:$0xff] }
  0xb7   : > { %2410 = vmatpush1.msk.msra.mxu1 %vm631_vm0, %v581_v3  ;;  %941 = vmatpush1.msra.mxu0 %v341_v5  ;;  %v221_v3 = vld [vmem:[#allocation5 + $0x20] sm:$0xff]  ;;  %v335_v5 = vld [vmem:[#allocation5 + $0x3b0] sm:$0xff] }
  0xb8   : > { %1017 = vmatprep.subr.mxu1 %v574_v7  ;;  %942 = vmatprep.subr.mxu0 %v334_v8  ;;  %v470_v7 = vld [vmem:[#allocation5 + $0x7e8] sm:$0xff]  ;;  %v328_v8 = vld [vmem:[#allocation5 + $0x378] sm:$0xff] }
  0xb9   : > { %1018 = vmatpush1.msra.mxu1 %v573_v9  ;;  %943 = vmatpush1.msra.mxu0 %v333_v10  ;;  %v469_v9 = vld [vmem:[#allocation5 + $0x7e0] sm:$0xff]  ;;  %v327_v10 = vld [vmem:[#allocation5 + $0x370] sm:$0xff] }
  0xba   : > { %1019 = vmatprep.subr.mxu1 %v566_v11  ;;  %944 = vmatprep.subr.mxu0 %v326_v12  ;;  %v462_v11 = vld [vmem:[#allocation5 + $0x7a8] sm:$0xff]  ;;  %v320_v12 = vld [vmem:[#allocation5 + $0x338] sm:$0xff] }
  0xbb   : > { %1020 = vmatpush1.msra.mxu1 %v565_v13  ;;  %945 = vmatpush1.msra.mxu0 %v325_v14  ;;  %v461_v13 = vld [vmem:[#allocation5 + $0x7a0] sm:$0xff]  ;;  %v454_v14 = vld [vmem:[#allocation5 + $0x768] sm:$0xff] }
  0xbc   : > { %1021 = vmatprep.subr.mxu1 %v558_v15  ;;  %946 = vmatprep.subr.mxu0 %v318_v16  ;;  %v312_v15 = vld [vmem:[#allocation5 + $0x2f8] sm:$0xff]  ;;  %v453_v16 = vld [vmem:[#allocation5 + $0x760] sm:$0xff] }
  0xbd   : > { %1022 = vmatpush1.msra.mxu1 %v557_v17  ;;  %947 = vmatpush1.msra.mxu0 %v317_v18  ;;  %v311_v17 = vld [vmem:[#allocation5 + $0x2f0] sm:$0xff]  ;;  %v446_v18 = vld [vmem:[#allocation5 + $0x728] sm:$0xff] }
  0xbe   : > { %1023 = vmatprep.subr.mxu1 %v550_v19  ;;  %948 = vmatprep.subr.mxu0 %v310_v20  ;;  %v304_v19 = vld [vmem:[#allocation5 + $0x2b8] sm:$0xff]  ;;  %v445_v20 = vld [vmem:[#allocation5 + $0x720] sm:$0xff] }
  0xbf   : > { %1024 = vmatpush1.msra.mxu1 %v549_v21  ;;  %949 = vmatpush1.msra.mxu0 %v309_v22  ;;  %v303_v21 = vld [vmem:[#allocation5 + $0x2b0] sm:$0xff]  ;;  %v438_v22 = vld [vmem:[#allocation5 + $0x6e8] sm:$0xff] }
  0xc0   : > { %1025 = vmatprep.subr.mxu1 %v542_v23  ;;  %950 = vmatprep.subr.mxu0 %v302_v24  ;;  %v296_v23 = vld [vmem:[#allocation5 + $0x278] sm:$0xff]  ;;  %v437_v24 = vld [vmem:[#allocation5 + $0x6e0] sm:$0xff] }
  0xc1   : > { %1026 = vmatpush1.msra.mxu1 %v541_v25  ;;  %951 = vmatpush1.msra.mxu0 %v301_v26  ;;  %v295_v25 = vld [vmem:[#allocation5 + $0x270] sm:$0xff]  ;;  %v430_v26 = vld [vmem:[#allocation5 + $0x6a8] sm:$0xff] }
  0xc2   : > { %1027 = vmatprep.subr.mxu1 %v534_v27  ;;  %952 = vmatprep.subr.mxu0 %v294_v28  ;;  %v288_v27 = vld [vmem:[#allocation5 + $0x238] sm:$0xff]  ;;  %v429_v28 = vld [vmem:[#allocation5 + $0x6a0] sm:$0xff] }
  0xc3   : > { %1028 = vmatpush1.msra.mxu1 %v533_v29  ;;  %953 = vmatpush1.msra.mxu0 %v293_v30  ;;  %v287_v29 = vld [vmem:[#allocation5 + $0x230] sm:$0xff]  ;;  %v422_v30 = vld [vmem:[#allocation5 + $0x668] sm:$0xff] }
  0xc4   : > { %1029 = vmatprep.subr.mxu1 %v526_v31  ;;  %954 = vmatprep.subr.mxu0 %v286_v32  ;;  %v280_v31 = vld [vmem:[#allocation5 + $0x1f8] sm:$0xff]  ;;  %v421_v32 = vld [vmem:[#allocation5 + $0x660] sm:$0xff] }
  0xc5   : > { %1030 = vmatpush1.msra.mxu1 %v525_v33  ;;  %955 = vmatpush1.msra.mxu0 %v285_v34  ;;  %v279_v33 = vld [vmem:[#allocation5 + $0x1f0] sm:$0xff]  ;;  %v414_v34 = vld [vmem:[#allocation5 + $0x628] sm:$0xff] }
  0xc6   : > { %1031 = vmatprep.subr.mxu1 %v518_v35  ;;  %956 = vmatprep.subr.mxu0 %v278_v36  ;;  %v272_v35 = vld [vmem:[#allocation5 + $0x1b8] sm:$0xff]  ;;  %v413_v36 = vld [vmem:[#allocation5 + $0x620] sm:$0xff] }
  0xc7   : > { %1032 = vmatpush1.msra.mxu1 %v517_v37  ;;  %957 = vmatpush1.msra.mxu0 %v277_v38  ;;  %v271_v37 = vld [vmem:[#allocation5 + $0x1b0] sm:$0xff]  ;;  %v406_v38 = vld [vmem:[#allocation5 + $0x5e8] sm:$0xff] }
  0xc8   : > { %1033 = vmatprep.subr.mxu1 %v510_v39  ;;  %958 = vmatprep.subr.mxu0 %v270_v40  ;;  %v264_v39 = vld [vmem:[#allocation5 + $0x178] sm:$0xff]  ;;  %v405_v40 = vld [vmem:[#allocation5 + $0x5e0] sm:$0xff] }
  0xc9   : > { %1034 = vmatpush1.msra.mxu1 %v509_v41  ;;  %959 = vmatpush1.msra.mxu0 %v269_v42  ;;  %v263_v41 = vld [vmem:[#allocation5 + $0x170] sm:$0xff]  ;;  %v398_v42 = vld [vmem:[#allocation5 + $0x5a8] sm:$0xff] }
  0xca   : > { %1035 = vmatprep.subr.mxu1 %v502_v43  ;;  %960 = vmatprep.subr.mxu0 %v262_v44  ;;  %v256_v43 = vld [vmem:[#allocation5 + $0x138] sm:$0xff]  ;;  %v397_v44 = vld [vmem:[#allocation5 + $0x5a0] sm:$0xff] }
  0xcb   : > { %1036 = vmatpush1.msra.mxu1 %v501_v45  ;;  %961 = vmatpush1.msra.mxu0 %v261_v46  ;;  %v255_v45 = vld [vmem:[#allocation5 + $0x130] sm:$0xff]  ;;  %v390_v46 = vld [vmem:[#allocation5 + $0x568] sm:$0xff] }
  0xcc   : > { %1037 = vmatprep.subr.mxu1 %v494_v47  ;;  %962 = vmatprep.subr.mxu0 %v254_v48  ;;  %v248_v47 = vld [vmem:[#allocation5 + $0xf8] sm:$0xff]  ;;  %v389_v48 = vld [vmem:[#allocation5 + $0x560] sm:$0xff] }
  0xcd   : > { %1038 = vmatpush1.msra.mxu1 %v493_v49  ;;  %963 = vmatpush1.msra.mxu0 %v253_v50  ;;  %v247_v49 = vld [vmem:[#allocation5 + $0xf0] sm:$0xff]  ;;  %v382_v50 = vld [vmem:[#allocation5 + $0x528] sm:$0xff] }
  0xce   : > { %1039 = vmatprep.subr.mxu1 %v486_v51  ;;  %964 = vmatprep.subr.mxu0 %v246_v52  ;;  %v240_v51 = vld [vmem:[#allocation5 + $0xb8] sm:$0xff]  ;;  %v381_v52 = vld [vmem:[#allocation5 + $0x520] sm:$0xff] }
  0xcf   : > { %1040 = vmatpush1.msra.mxu1 %v485_v53  ;;  %965 = vmatpush1.msra.mxu0 %v245_v54  ;;  %v239_v53 = vld [vmem:[#allocation5 + $0xb0] sm:$0xff]  ;;  %v374_v54 = vld [vmem:[#allocation5 + $0x4e8] sm:$0xff] }
  0xd0   : > { %1041 = vmatprep.subr.mxu1 %v478_v55  ;;  %966 = vmatprep.subr.mxu0 %v238_v56  ;;  %v232_v55 = vld [vmem:[#allocation5 + $0x78] sm:$0xff]  ;;  %v373_v56 = vld [vmem:[#allocation5 + $0x4e0] sm:$0xff] }
  0xd1   : > { %1042 = vmatpush1.msra.mxu1 %v477_v57  ;;  %967 = vmatpush1.msra.mxu0 %v237_v59  ;;  %v231_v57 = vld [vmem:[#allocation5 + $0x70] sm:$0xff]  ;;  %v366_v59 = vld [vmem:[#allocation5 + $0x4a8] sm:$0xff] }
  0xd2   : > { %1075 = vmatprep.mubr.f32.mxu1 %v2716_v0  ;;  %968 = vmatprep.subr.mxu0 %v230_v60  ;;  %v224_v60 = vld [vmem:[#allocation5 + $0x38] sm:$0xff] }
  0xd3   : > { %2411 = vmatmul.mubr.msk.f32.vlgmr.msra.gmra.mxu1 %vm627_vm1, %v2878_v58  ;;  %1082 = vmatprep.subr.mxu1 %v344_v61  ;;  %v319_v58 = vld [vmem:[#allocation5 + $0x330] sm:$0xff]  ;;  %v365_v61 = vld [vmem:[#allocation5 + $0x4a0] sm:$0xff] }
  0xd4   : > { %969 = vmatpush1.msra.mxu0 %v229_v62  ;;  %1083 = vmatpush1.msra.mxu1 %v343_v63  ;;  %v223_v62 = vld [vmem:[#allocation5 + $0x30] sm:$0xff]  ;;  %v358_v63 = vld [vmem:[#allocation5 + $0x468] sm:$0xff] }
  0xd5   : > { %970 = vmatprep.subr.mxu0 %v222_v1  ;;  %1084 = vmatprep.subr.mxu1 %v336_v2  ;;  %v472_v1 = vld [vmem:[#allocation5 + $0x7f8] sm:$0xff]  ;;  %v357_v2 = vld [vmem:[#allocation5 + $0x460] sm:$0xff] }
  0xd6   : > { %971 = vmatpush1.msra.mxu0 %v221_v3  ;;  %1085 = vmatpush1.msra.mxu1 %v335_v5  ;;  %v471_v3 = vld [vmem:[#allocation5 + $0x7f0] sm:$0xff]  ;;  %v350_v5 = vld [vmem:[#allocation5 + $0x428] sm:$0xff] }
  0xd7   : > { %972 = vmatprep.subr.mxu0 %v470_v7  ;;  %1086 = vmatprep.subr.mxu1 %v328_v8  ;;  %v464_v7 = vld [vmem:[#allocation5 + $0x7b8] sm:$0xff]  ;;  %v349_v8 = vld [vmem:[#allocation5 + $0x420] sm:$0xff] }
  0xd8   : > { %973 = vmatpush2.msra.mxu0 %v469_v9  ;;  %1087 = vmatpush1.msra.mxu1 %v327_v10  ;;  %v463_v9 = vld [vmem:[#allocation5 + $0x7b0] sm:$0xff]  ;;  %v456_v10 = vld [vmem:[#allocation5 + $0x778] sm:$0xff] }
  0xd9   : > { %974 = vmatprep.subr.mxu0 %v462_v11  ;;  %1088 = vmatprep.subr.mxu1 %v320_v12  ;;  %v584_v11 = vld [vmem:[#allocation5 + $0xb78] sm:$0x7f]  ;;  %v455_v12 = vld [vmem:[#allocation5 + $0x770] sm:$0xff] }
  0xda   : > { %975 = vmatpush2.msra.mxu0 %v461_v13  ;;  %1089 = vmatpush1.msra.mxu1 %v319_v58  ;;  %v583_v13 = vld [vmem:[#allocation5 + $0xb70] sm:$0x7f]  ;;  %v448_v58 = vld [vmem:[#allocation5 + $0x738] sm:$0xff] }
  0xdb   : > { %976 = vmatprep.subr.mxu0 %v454_v14  ;;  %1090 = vmatprep.subr.mxu1 %v312_v15  ;;  %v576_v14 = vld [vmem:[#allocation5 + $0xb38] sm:$0xff]  ;;  %v447_v15 = vld [vmem:[#allocation5 + $0x730] sm:$0xff] }
  0xdc   : > { %977 = vmatpush2.msra.mxu0 %v453_v16  ;;  %1091 = vmatpush1.msra.mxu1 %v311_v17  ;;  %v575_v16 = vld [vmem:[#allocation5 + $0xb30] sm:$0xff]  ;;  %v440_v17 = vld [vmem:[#allocation5 + $0x6f8] sm:$0xff] }
  0xdd   : > { %978 = vmatprep.subr.mxu0 %v446_v18  ;;  %1092 = vmatprep.subr.mxu1 %v304_v19  ;;  %v568_v18 = vld [vmem:[#allocation5 + $0xaf8] sm:$0xff]  ;;  %v439_v19 = vld [vmem:[#allocation5 + $0x6f0] sm:$0xff] }
  0xde   : > { %979 = vmatpush2.msra.mxu0 %v445_v20  ;;  %1093 = vmatpush1.msra.mxu1 %v303_v21  ;;  %v567_v20 = vld [vmem:[#allocation5 + $0xaf0] sm:$0xff]  ;;  %v432_v21 = vld [vmem:[#allocation5 + $0x6b8] sm:$0xff] }
  0xdf   : > { %980 = vmatprep.subr.mxu0 %v438_v22  ;;  %1094 = vmatprep.subr.mxu1 %v296_v23  ;;  %v560_v22 = vld [vmem:[#allocation5 + $0xab8] sm:$0xff]  ;;  %v431_v23 = vld [vmem:[#allocation5 + $0x6b0] sm:$0xff] }
  0xe0   : > { %981 = vmatpush2.msra.mxu0 %v437_v24  ;;  %1095 = vmatpush1.msra.mxu1 %v295_v25  ;;  %v559_v24 = vld [vmem:[#allocation5 + $0xab0] sm:$0xff]  ;;  %v424_v25 = vld [vmem:[#allocation5 + $0x678] sm:$0xff] }
  0xe1   : > { %982 = vmatprep.subr.mxu0 %v430_v26  ;;  %1096 = vmatprep.subr.mxu1 %v288_v27  ;;  %v552_v26 = vld [vmem:[#allocation5 + $0xa78] sm:$0xff]  ;;  %v423_v27 = vld [vmem:[#allocation5 + $0x670] sm:$0xff] }
  0xe2   : > { %983 = vmatpush2.msra.mxu0 %v429_v28  ;;  %1097 = vmatpush1.msra.mxu1 %v287_v29  ;;  %v551_v28 = vld [vmem:[#allocation5 + $0xa70] sm:$0xff]  ;;  %v416_v29 = vld [vmem:[#allocation5 + $0x638] sm:$0xff] }
  0xe3   : > { %984 = vmatprep.subr.mxu0 %v422_v30  ;;  %1098 = vmatprep.subr.mxu1 %v280_v31  ;;  %v544_v30 = vld [vmem:[#allocation5 + $0xa38] sm:$0xff]  ;;  %v415_v31 = vld [vmem:[#allocation5 + $0x630] sm:$0xff] }
  0xe4   : > { %985 = vmatpush2.msra.mxu0 %v421_v32  ;;  %1099 = vmatpush1.msra.mxu1 %v279_v33  ;;  %v543_v32 = vld [vmem:[#allocation5 + $0xa30] sm:$0xff]  ;;  %v408_v33 = vld [vmem:[#allocation5 + $0x5f8] sm:$0xff] }
  0xe5   : > { %986 = vmatprep.subr.mxu0 %v414_v34  ;;  %1100 = vmatprep.subr.mxu1 %v272_v35  ;;  %v536_v34 = vld [vmem:[#allocation5 + $0x9f8] sm:$0xff]  ;;  %v407_v35 = vld [vmem:[#allocation5 + $0x5f0] sm:$0xff] }
  0xe6   : > { %987 = vmatpush2.msra.mxu0 %v413_v36  ;;  %1101 = vmatpush1.msra.mxu1 %v271_v37  ;;  %v535_v36 = vld [vmem:[#allocation5 + $0x9f0] sm:$0xff]  ;;  %v400_v37 = vld [vmem:[#allocation5 + $0x5b8] sm:$0xff] }
  0xe7   : > { %988 = vmatprep.subr.mxu0 %v406_v38  ;;  %1102 = vmatprep.subr.mxu1 %v264_v39  ;;  %v528_v38 = vld [vmem:[#allocation5 + $0x9b8] sm:$0xff]  ;;  %v399_v39 = vld [vmem:[#allocation5 + $0x5b0] sm:$0xff] }
  0xe8   : > { %989 = vmatpush2.msra.mxu0 %v405_v40  ;;  %1103 = vmatpush1.msra.mxu1 %v263_v41  ;;  %v527_v40 = vld [vmem:[#allocation5 + $0x9b0] sm:$0xff]  ;;  %v392_v41 = vld [vmem:[#allocation5 + $0x578] sm:$0xff] }
  0xe9   : > { %990 = vmatprep.subr.mxu0 %v398_v42  ;;  %1104 = vmatprep.subr.mxu1 %v256_v43  ;;  %v520_v42 = vld [vmem:[#allocation5 + $0x978] sm:$0xff]  ;;  %v391_v43 = vld [vmem:[#allocation5 + $0x570] sm:$0xff] }
  0xea   : > { %991 = vmatpush2.msra.mxu0 %v397_v44  ;;  %1105 = vmatpush1.msra.mxu1 %v255_v45  ;;  %v519_v44 = vld [vmem:[#allocation5 + $0x970] sm:$0xff]  ;;  %v384_v45 = vld [vmem:[#allocation5 + $0x538] sm:$0xff] }
  0xeb   : > { %992 = vmatprep.subr.mxu0 %v390_v46  ;;  %1106 = vmatprep.subr.mxu1 %v248_v47  ;;  %v512_v46 = vld [vmem:[#allocation5 + $0x938] sm:$0xff]  ;;  %v383_v47 = vld [vmem:[#allocation5 + $0x530] sm:$0xff] }
  0xec   : > { %993 = vmatpush2.msra.mxu0 %v389_v48  ;;  %1107 = vmatpush1.msra.mxu1 %v247_v49  ;;  %v511_v48 = vld [vmem:[#allocation5 + $0x930] sm:$0xff]  ;;  %v376_v49 = vld [vmem:[#allocation5 + $0x4f8] sm:$0xff] }
  0xed   : > { %994 = vmatprep.subr.mxu0 %v382_v50  ;;  %1108 = vmatprep.subr.mxu1 %v240_v51  ;;  %v504_v50 = vld [vmem:[#allocation5 + $0x8f8] sm:$0xff]  ;;  %v375_v51 = vld [vmem:[#allocation5 + $0x4f0] sm:$0xff] }
  0xee   : > { %995 = vmatpush2.msra.mxu0 %v381_v52  ;;  %1109 = vmatpush1.msra.mxu1 %v239_v53  ;;  %v503_v52 = vld [vmem:[#allocation5 + $0x8f0] sm:$0xff]  ;;  %v368_v53 = vld [vmem:[#allocation5 + $0x4b8] sm:$0xff] }
  0xef   : > { %996 = vmatprep.subr.mxu0 %v374_v54  ;;  %1110 = vmatprep.subr.mxu1 %v232_v55  ;;  %v496_v54 = vld [vmem:[#allocation5 + $0x8b8] sm:$0xff]  ;;  %v367_v55 = vld [vmem:[#allocation5 + $0x4b0] sm:$0xff] }
  0xf0   : > { %997 = vmatpush2.msra.mxu0 %v373_v56  ;;  %1111 = vmatpush1.msra.mxu1 %v231_v57  ;;  %v495_v56 = vld [vmem:[#allocation5 + $0x8b0] sm:$0xff]  ;;  %v360_v57 = vld [vmem:[#allocation5 + $0x478] sm:$0xff] }
  0xf1   : > { %998 = vmatprep.subr.mxu0 %v366_v59  ;;  %1112 = vmatprep.subr.mxu1 %v224_v60  ;;  %v488_v59 = vld [vmem:[#allocation5 + $0x878] sm:$0xff]  ;;  %v359_v60 = vld [vmem:[#allocation5 + $0x470] sm:$0xff] }
  0xf2   : > { %999 = vmatpush2.msra.mxu0 %v365_v61  ;;  %1113 = vmatpush1.msra.mxu1 %v223_v62  ;;  %v487_v61 = vld [vmem:[#allocation5 + $0x870] sm:$0xff]  ;;  %v352_v62 = vld [vmem:[#allocation5 + $0x438] sm:$0xff] }
  0xf3   : > { %1000 = vmatprep.subr.mxu0 %v358_v63  ;;  %1114 = vmatprep.subr.mxu1 %v472_v1  ;;  %v480_v63 = vld [vmem:[#allocation5 + $0x838] sm:$0xff]  ;;  %v351_v1 = vld [vmem:[#allocation5 + $0x430] sm:$0xff] }
  0xf4   : > { %1001 = vmatpush2.msra.mxu0 %v357_v2  ;;  %1115 = vmatpush2.msra.mxu1 %v471_v3  ;;  %v479_v2 = vld [vmem:[#allocation5 + $0x830] sm:$0xff]  ;;  %v2560_v3 = vld [vmem:[%s2864_s4 + $0x10] sm:$0xff] }
  0xf5   : > { %1002 = vmatprep.subr.mxu0 %v350_v5  ;;  %1116 = vmatprep.subr.mxu1 %v464_v7  ;;  %v587_v5 = vlaneseq }
  0xf6   : > { %1003 = vmatpush2.msra.mxu0 %v349_v8  ;;  %1004 = vmatprep.mubr.f32.mxu0 %v2883_v4 }
  0xf7   : > { %1117 = vmatpush2.msra.mxu1 %v463_v9  ;;  %1005 = vmatmul.mubr.f32.vlgmr.msra.gmra.mxu0 %v2886_v6  ;;  %v2911_v7 = vshrl.u32 %v587_v5, 7  ;;  %v2916_v9 = vld [vmem:[#allocation7] sm:$0xff] }
  0xf8   : > { %1118 = vmatprep.subr.mxu1 %v456_v10  ;;  %2412 = vmatprep.subr.msk.mxu0 %vm631_vm0, %v584_v11 }
  0xf9   : > { %1119 = vmatpush2.msra.mxu1 %v455_v12  ;;  %2413 = vmatpush1.msk.msra.mxu0 %vm631_vm0, %v583_v13  ;;  %v2914_v8 = vsub.s32 0, %v2911_v7  ;;  %v593_v10 = vsub.s32 1, %v2911_v7 }
  0xfa   : > { %1120 = vmatprep.subr.mxu1 %v448_v58  ;;  %1159 = vmatprep.subr.mxu0 %v576_v14 }
  0xfb   : > { %1121 = vmatpush2.msra.mxu1 %v447_v15  ;;  %1160 = vmatpush1.msra.mxu0 %v575_v16 }
  0xfc   : > { %1122 = vmatprep.subr.mxu1 %v440_v17  ;;  %1161 = vmatprep.subr.mxu0 %v568_v18 }
  0xfd   : > { %1123 = vmatpush2.msra.mxu1 %v439_v19  ;;  %1162 = vmatpush1.msra.mxu0 %v567_v20 }
  0xfe   : > { %1124 = vmatprep.subr.mxu1 %v432_v21  ;;  %1163 = vmatprep.subr.mxu0 %v560_v22  ;;  %v597_v22 = vsub.s32 2, %v2911_v7 }
  0xff   : > { %1125 = vmatpush2.msra.mxu1 %v431_v23  ;;  %1164 = vmatpush1.msra.mxu0 %v559_v24 }
 0x100   : > { %1126 = vmatprep.subr.mxu1 %v424_v25  ;;  %1165 = vmatprep.subr.mxu0 %v552_v26  ;;  %v601_v25 = vsub.s32 3, %v2911_v7 }
 0x101   : > { %1127 = vmatpush2.msra.mxu1 %v423_v27  ;;  %1166 = vmatpush1.msra.mxu0 %v551_v28  ;;  %v598_v28 = vrot.slane %v2916_v9, %v597_v22 }
 0x102   : > { %1128 = vmatprep.subr.mxu1 %v416_v29  ;;  %1167 = vmatprep.subr.mxu0 %v544_v30  ;;  %v602_v30 = vrot.slane %v2916_v9, %v601_v25 }
 0x103   : > { %1129 = vmatpush2.msra.mxu1 %v415_v31  ;;  %1168 = vmatpush1.msra.mxu0 %v543_v32 }
 0x104   : > { %1130 = vmatprep.subr.mxu1 %v408_v33  ;;  %1169 = vmatprep.subr.mxu0 %v536_v34 }
 0x105   : > { %1131 = vmatpush2.msra.mxu1 %v407_v35  ;;  %1170 = vmatpush1.msra.mxu0 %v535_v36 }
 0x106   : > { %1132 = vmatprep.subr.mxu1 %v400_v37  ;;  %1171 = vmatprep.subr.mxu0 %v528_v38 }
 0x107   : > { %1133 = vmatpush2.msra.mxu1 %v399_v39  ;;  %1172 = vmatpush1.msra.mxu0 %v527_v40 }
 0x108   : > { %1134 = vmatprep.subr.mxu1 %v392_v41  ;;  %1173 = vmatprep.subr.mxu0 %v520_v42 }
 0x109   : > { %1135 = vmatpush2.msra.mxu1 %v391_v43  ;;  %1174 = vmatpush1.msra.mxu0 %v519_v44 }
 0x10a   : > { %1136 = vmatprep.subr.mxu1 %v384_v45  ;;  %1175 = vmatprep.subr.mxu0 %v512_v46 }
 0x10b   : > { %1137 = vmatpush2.msra.mxu1 %v383_v47  ;;  %1176 = vmatpush1.msra.mxu0 %v511_v48 }
 0x10c   : > { %1138 = vmatprep.subr.mxu1 %v376_v49  ;;  %1177 = vmatprep.subr.mxu0 %v504_v50 }
 0x10d   : > { %1139 = vmatpush2.msra.mxu1 %v375_v51  ;;  %1178 = vmatpush1.msra.mxu0 %v503_v52  ;;  %v2717_v52 = vmov 1966171168  }
 0x10e   : > { %1140 = vmatprep.subr.mxu1 %v368_v53  ;;  %1179 = vmatprep.subr.mxu0 %v496_v54  ;;  %v1323_v53 = vunpack.c.l.s4 %v2717_v52 }
 0x10f   : > { %1141 = vmatpush2.msra.mxu1 %v367_v55  ;;  %1180 = vmatpush1.msra.mxu0 %v495_v56 }
 0x110   : > { %1142 = vmatprep.subr.mxu1 %v360_v57  ;;  %1181 = vmatprep.subr.mxu0 %v488_v59  ;;  %v1324_v56 = vunpack.c.0.s8 %v1323_v53 }
 0x111   : > { %1143 = vmatpush2.msra.mxu1 %v359_v60  ;;  %1182 = vmatpush1.msra.mxu0 %v487_v61  ;;  %v2718_v60 = vmov 1983009808  }
 0x112   : > { %1144 = vmatprep.subr.mxu1 %v352_v62  ;;  %1183 = vmatprep.subr.mxu0 %v480_v63  ;;  %v1405_v61 = vunpack.c.l.s4 %v2718_v60 }
 0x113   : > { %1145 = vmatpush2.msra.mxu1 %v351_v1  ;;  %1146 = vmatprep.mubr.f32.mxu1 %v2883_v4  ;;  %v590_v4 = vrot.slane %v2916_v9, %v2914_v8  ;;  %v2927_v1 = vsub.s32 %v1324_v56, %v2911_v7 }
 0x114   : > { %1184 = vmatpush1.msra.mxu0 %v479_v2  ;;  %1217 = vmatprep.mubr.f32.mxu0 %v2716_v0  ;;  %v594_v0 = vrot.slane %v2916_v9, %v593_v10 }
 0x115   : > { %1147 = vmatmul.mubr.f32.vlgmr.msra.gmra.mxu1 %v2886_v6  ;;  %2414 = vmatmul.mubr.msk.f32.vlgmr.msra.gmra.mxu0 %vm627_vm1, %v2560_v3 }
 0x133   : > { %v793_v11 = vpop.f32.mrf.mxu1 }
 0x135   : > { %v795_v15 = vpop.f32.mrf.mxu1 }
 0x157   : > { %v722_v6 = vpop.f32.mrf.mxu0 }
 0x158   : > { %v723_v12 = vadd.f32 %v722_v6, %v590_v4  ;;  %v1406_v4 = vunpack.c.0.s8 %v1405_v61 }
 0x159   : > { %v724_v13 = vpop.f32.mrf.mxu0 }
 0x15a   : > { %v794_v58 = vadd.f32 %v793_v11, %v723_v12  ;;  %v725_v14 = vadd.f32 %v724_v13, %v594_v0 }
 0x15c   : > { %v1224_v16 = vmul.f32 0.5, %v794_v58  ;;  %v796_v17 = vadd.f32 %v795_v15, %v725_v14  ;;  %v2933_v15 = vsub.s32 %v1406_v4, %v2911_v7 }
 0x15e   : > { %2512 = vtanh.f32 %v1224_v16  ;;  %v1225_v18 = vmul.f32 0.5, %v796_v17 }
 0x160   : > { %2514 = vtanh.f32 %v1225_v18 }
 0x16b   : > { %v2513_v19 = vpop.eup %2512 }
 0x16c   : > { %v1240_v20 = vadd.f32 1.0, %v2513_v19 }
 0x16d   : > { %v2515_v21 = vpop.eup %2514 }
 0x16e   : > { %v1248_v23 = vmul.f32 0.5, %v1240_v20  ;;  %v1241_v24 = vadd.f32 1.0, %v2515_v21 }
 0x170   : > { %v1256_v26 = vmul.f32 0.5, %v1248_v23  ;;  %v1249_v27 = vmul.f32 0.5, %v1241_v24 }
 0x172   : > { %2516 = vtanh.f32 %v1256_v26  ;;  %v1257_v29 = vmul.f32 0.5, %v1249_v27 }
 0x174   : > { %2518 = vtanh.f32 %v1257_v29  ;;  %v864_v31 = vpop.f32.mrf.mxu1 }
 0x175   : > { %v865_v32 = vadd.f32 %v864_v31, %v598_v28 }
 0x176   : > { %v935_v33 = vpop.f32.mrf.mxu0  ;;  %v866_v34 = vpop.f32.mrf.mxu1 }
 0x177   : > { %v936_v35 = vadd.f32 %v935_v33, %v865_v32  ;;  %v867_v36 = vadd.f32 %v866_v34, %v602_v30 }
 0x178   : > { %v937_v37 = vpop.f32.mrf.mxu0 }
 0x179   : > { %v1226_v38 = vmul.f32 0.5, %v936_v35  ;;  %v938_v39 = vadd.f32 %v937_v37, %v867_v36 }
 0x17b   : > { %2520 = vtanh.f32 %v1226_v38  ;;  %v1227_v40 = vmul.f32 0.5, %v938_v39 }
 0x17d   : > { %2522 = vtanh.f32 %v1227_v40 }
 0x17f   : > { %v2517_v41 = vpop.eup %2516 }
 0x180   : > { %v1272_v42 = vadd.f32 1.0, %v2517_v41 }
 0x181   : > { %v2519_v43 = vpop.eup %2518 }
 0x182   : > { %v1280_v44 = vmul.f32 0.5, %v1272_v42  ;;  %v1273_v45 = vadd.f32 1.0, %v2519_v43 }
 0x184   : > { %v1288_v46 = vmul.f32 0.5, %v1280_v44  ;;  %v1281_v47 = vmul.f32 0.5, %v1273_v45 }
 0x186   : > { %2524 = vtanh.f32 %v1288_v46  ;;  %v1289_v48 = vmul.f32 0.5, %v1281_v47 }
 0x188   : > { %v2521_v49 = vpop.eup %2520  ;;  %2526 = vtanh.f32 %v1289_v48 }
 0x189   : > { %v1242_v51 = vadd.f32 1.0, %v2521_v49 }
 0x18a   : > { %v2523_v50 = vpop.eup %2522 }
 0x18b   : > { %v1243_v54 = vadd.f32 1.0, %v2523_v50  ;;  %v1250_v55 = vmul.f32 0.5, %v1242_v51 }
 0x18d   : > { %v1251_v57 = vmul.f32 0.5, %v1243_v54  ;;  %v1258_v62 = vmul.f32 0.5, %v1250_v55 }
 0x18f   : > { %v1259_v2 = vmul.f32 0.5, %v1251_v57  ;;  %2528 = vtanh.f32 %v1258_v62 }
 0x191   : > { %2530 = vtanh.f32 %v1259_v2 }
 0x193   : > { %v2525_v59 = vpop.eup %2524 }
 0x194   : > { %v1304_v63 = vadd.f32 1.0, %v2525_v59 }
 0x195   : > { %v2527_v3 = vpop.eup %2526 }
 0x196   : > { %v1312_v5 = vmul.f32 0.5, %v1304_v63  ;;  %v1305_v10 = vadd.f32 1.0, %v2527_v3 }
 0x198   : > { %v1321_v0 = vcombine.high %v1312_v5, %v1312_v5  ;;  %v1328_v11 = vrot.slane %v1312_v5, %v2927_v1  ;;  %v1313_v6 = vmul.f32 0.5, %v1305_v10 }
 0x19a   : > { %v1335_v12 = vrot.slane %v1321_v0, %v2927_v1  ;;  %v1336_v13 = vcombine.high %v1328_v11, %v1328_v11  ;;  %v1344_v58 = vrot.slane %v1328_v11, %v2927_v1  ;;  %v1441_v14 = vcombine.high %v1313_v6, %v1313_v6 }
 0x19b   : > { %v1448_v16 = vrot.slane %v1313_v6, %v2927_v1 }
 0x19c   : > { %v1337_v17 = vcombine.high %v1335_v12, %v1335_v12  ;;  %v1351_v18 = vrot.slane %v1335_v12, %v2927_v1  ;;  %v1358_v19 = vrot.slane %v1336_v13, %v2927_v1  ;;  %v1366_v20 = vcombine.high %v1344_v58, %v1344_v58  ;;  %v2529_v49 = vpop.eup %2528 }
 0x19d   : > { %v1373_v21 = vrot.slane %v1344_v58, %v2914_v8  ;;  %v1455_v22 = vrot.slane %v1441_v14, %v2927_v1  ;;  %v1456_v23 = vcombine.high %v1448_v16, %v1448_v16  ;;  %v1464_v24 = vrot.slane %v1448_v16, %v2927_v1 }
 0x19e   : > { %v1365_v25 = vrot.slane %v1337_v17, %v2927_v1  ;;  %v1367_v26 = vcombine.high %v1351_v18, %v1351_v18  ;;  %v1368_v27 = vcombine.high %v1358_v19, %v1358_v19  ;;  %v1377_v28 = vrot.slane %v1358_v19, %v2914_v8  ;;  %v2531_v54 = vpop.eup %2530 }
 0x19f   : > { %v1381_v29 = vrot.slane %v1366_v20, %v2914_v8  ;;  %v1389_v30 = vrot.slane %v1351_v18, %v2914_v8  ;;  %v1457_v31 = vcombine.high %v1455_v22, %v1455_v22  ;;  %v1471_v32 = vrot.slane %v1455_v22, %v2927_v1 }
 0x1a0   : > { %v1369_v33 = vcombine.high %v1365_v25, %v1365_v25  ;;  %v1385_v34 = vrot.slane %v1368_v27, %v2914_v8  ;;  %v1393_v35 = vrot.slane %v1365_v25, %v2914_v8  ;;  %v1397_v36 = vrot.slane %v1367_v26, %v2914_v8  ;;  %v1077_v25 = vpop.f32.mrf.mxu1 }
 0x1a1   : > { %v1402_v37 = vcombine.low %v1373_v21, %v1377_v28  ;;  %v1478_v38 = vrot.slane %v1456_v23, %v2927_v1  ;;  %v1485_v39 = vrot.slane %v1457_v31, %v2927_v1  ;;  %v1486_v40 = vcombine.high %v1464_v24, %v1464_v24 }
 0x1a2   : > { %v1401_v41 = vrot.slane %v1369_v33, %v2914_v8  ;;  %v1403_v42 = vcombine.low %v1381_v29, %v1385_v34  ;;  %v1419_v43 = vcombine.low %v1389_v30, %v1393_v35  ;;  %v1487_v44 = vcombine.high %v1471_v32, %v1471_v32  ;;  %v1079_v34 = vpop.f32.mrf.mxu1 }
 0x1a3   : > { %v1410_v45 = vrot.slane %v1402_v37, %v2933_v15  ;;  %v1488_v46 = vcombine.high %v1478_v38, %v1478_v38  ;;  %v1489_v47 = vcombine.high %v1485_v39, %v1485_v39  ;;  %v1493_v48 = vrot.slane %v1464_v24, %v2914_v8 }
 0x1a4   : > { %v1417_v50 = vrot.slane %v1403_v42, %v2933_v15  ;;  %v1420_v51 = vcombine.low %v1397_v36, %v1401_v41  ;;  %v1427_v52 = vrot.slane %v1419_v43, %v2933_v15  ;;  %v1497_v53 = vrot.slane %v1478_v38, %v2914_v8 }
 0x1a5   : > { %v1501_v55 = vrot.slane %v1486_v40, %v2914_v8  ;;  %v1505_v56 = vrot.slane %v1488_v46, %v2914_v8  ;;  %v1509_v57 = vrot.slane %v1471_v32, %v2914_v8  ;;  %v1513_v59 = vrot.slane %v1485_v39, %v2914_v8 }
 0x1a6   : > { %v1418_v60 = vcombine.low %v1410_v45, %v1417_v50  ;;  %v1434_v61 = vrot.slane %v1420_v51, %v2933_v15  ;;  %v1517_v62 = vrot.slane %v1487_v44, %v2914_v8  ;;  %v1521_v63 = vrot.slane %v1489_v47, %v2914_v8 }
 0x1a7   : > { %v1522_v2 = vcombine.low %v1493_v48, %v1497_v53  ;;  %v1523_v3 = vcombine.low %v1501_v55, %v1505_v56  ;;  %v1539_v5 = vcombine.low %v1509_v57, %v1513_v59  ;;  %v1274_v10 = vadd.f32 1.0, %v2529_v49 }
 0x1a8   : > { %v1435_v4 = vcombine.low %v1427_v52, %v1434_v61  ;;  %1438 = vst [vmem:[%s2965_s20] sm:$0xff] %v1418_v60  ;;  %v1540_v0 = vcombine.low %v1517_v62, %v1521_v63  ;;  %v1275_v11 = vadd.f32 1.0, %v2531_v54  ;;  %v605_v21 = vsub.s32 4, %v2911_v7 }
 0x1a9   : > { %v1530_v6 = vrot.slane %v1522_v2, %v2933_v15  ;;  %v1537_v12 = vrot.slane %v1523_v3, %v2933_v15  ;;  %v1282_v13 = vmul.f32 0.5, %v1274_v10  ;;  %v1547_v58 = vrot.slane %v1539_v5, %v2933_v15 }
 0x1aa   : > { %1439 = vst [vmem:[%s2965_s20 + $0x8] sm:$0xff] %v1435_v4  ;;  %v1554_v14 = vrot.slane %v1540_v0, %v2933_v15  ;;  %v1283_v16 = vmul.f32 0.5, %v1275_v11  ;;  %v609_v22 = vsub.s32 5, %v2911_v7  ;;  %v606_v23 = vrot.slane %v2916_v9, %v605_v21 }
 0x1ab   : > { %v1538_v17 = vcombine.low %v1530_v6, %v1537_v12  ;;  %v1290_v18 = vmul.f32 0.5, %v1282_v13  ;;  %v613_v51 = vsub.s32 6, %v2911_v7 }
 0x1ac   : > { %v1555_v19 = vcombine.low %v1547_v58, %v1554_v14  ;;  %v1291_v20 = vmul.f32 0.5, %v1283_v16  ;;  %v610_v24 = vrot.slane %v2916_v9, %v609_v22 }
 0x1ad   : > { %2415 = vst [vmem:[%s2965_s20 + $0x10] sm:$0xff] %v1538_v17  ;;  %2532 = vtanh.f32 %v1290_v18 }
 0x1ae   : > { %2416 = vst [vmem:[%s2965_s20 + $0x18] sm:$0xff] %v1555_v19  ;;  %2534 = vtanh.f32 %v1291_v20 }
 0x1b7   : > { %v1006_v26 = vpop.f32.mrf.mxu0 }
 0x1b8   : > { %v1007_v27 = vadd.f32 %v1006_v26, %v606_v23 }
 0x1b9   : > { %v1008_v28 = vpop.f32.mrf.mxu0 }
 0x1ba   : > { %v2533_v29 = vpop.eup %2532  ;;  %v1078_v30 = vadd.f32 %v1077_v25, %v1007_v27  ;;  %v1009_v31 = vadd.f32 %v1008_v28, %v610_v24 }
 0x1bb   : > { %v2535_v32 = vpop.eup %2534  ;;  %v1306_v33 = vadd.f32 1.0, %v2533_v29 }
 0x1bc   : > { %v1307_v35 = vadd.f32 1.0, %v2535_v32  ;;  %v1228_v36 = vmul.f32 0.5, %v1078_v30  ;;  %v1080_v37 = vadd.f32 %v1079_v34, %v1009_v31 }
 0x1bd   : > { %v1314_v38 = vmul.f32 0.5, %v1306_v33 }
 0x1be   : > { %v1315_v39 = vmul.f32 0.5, %v1307_v35  ;;  %2536 = vtanh.f32 %v1228_v36  ;;  %v1229_v40 = vmul.f32 0.5, %v1080_v37 }
 0x1bf   : > { %v1562_v41 = vcombine.high %v1314_v38, %v1314_v38  ;;  %v1569_v42 = vrot.slane %v1314_v38, %v2927_v1 }
 0x1c0   : > { %v1683_v43 = vcombine.high %v1315_v39, %v1315_v39  ;;  %v1690_v44 = vrot.slane %v1315_v39, %v2927_v1  ;;  %2538 = vtanh.f32 %v1229_v40 }
 0x1c1   : > { %v1576_v45 = vrot.slane %v1562_v41, %v2927_v1  ;;  %v1577_v46 = vcombine.high %v1569_v42, %v1569_v42  ;;  %v1585_v47 = vrot.slane %v1569_v42, %v2927_v1  ;;  %v617_v42 = vsub.s32 7, %v2911_v7 }
 0x1c2   : > { %v1697_v48 = vrot.slane %v1683_v43, %v2927_v1  ;;  %v1698_v49 = vcombine.high %v1690_v44, %v1690_v44  ;;  %v1706_v50 = vrot.slane %v1690_v44, %v2927_v1 }
 0x1c3   : > { %v1578_v52 = vcombine.high %v1576_v45, %v1576_v45  ;;  %v1592_v53 = vrot.slane %v1576_v45, %v2927_v1  ;;  %v1599_v54 = vrot.slane %v1577_v46, %v2927_v1  ;;  %v1607_v55 = vcombine.high %v1585_v47, %v1585_v47 }
 0x1c4   : > { %v1614_v56 = vrot.slane %v1585_v47, %v2914_v8  ;;  %v1699_v57 = vcombine.high %v1697_v48, %v1697_v48  ;;  %v1713_v59 = vrot.slane %v1697_v48, %v2927_v1  ;;  %v1720_v60 = vrot.slane %v1698_v49, %v2927_v1 }
 0x1c5   : > { %v1606_v61 = vrot.slane %v1578_v52, %v2927_v1  ;;  %v1608_v62 = vcombine.high %v1592_v53, %v1592_v53  ;;  %v1609_v63 = vcombine.high %v1599_v54, %v1599_v54  ;;  %v1618_v2 = vrot.slane %v1599_v54, %v2914_v8 }
 0x1c6   : > { %v1622_v3 = vrot.slane %v1607_v55, %v2914_v8  ;;  %v1630_v5 = vrot.slane %v1592_v53, %v2914_v8  ;;  %v1727_v10 = vrot.slane %v1699_v57, %v2927_v1  ;;  %v1728_v4 = vcombine.high %v1706_v50, %v1706_v50 }
 0x1c7   : > { %v1610_v0 = vcombine.high %v1606_v61, %v1606_v61  ;;  %v1626_v11 = vrot.slane %v1609_v63, %v2914_v8  ;;  %v1634_v6 = vrot.slane %v1606_v61, %v2914_v8  ;;  %v1638_v12 = vrot.slane %v1608_v62, %v2914_v8 }
 0x1c8   : > { %v1643_v13 = vcombine.low %v1614_v56, %v1618_v2  ;;  %v1729_v58 = vcombine.high %v1713_v59, %v1713_v59  ;;  %v1730_v14 = vcombine.high %v1720_v60, %v1720_v60  ;;  %v1731_v16 = vcombine.high %v1727_v10, %v1727_v10 }
 0x1c9   : > { %v1642_v17 = vrot.slane %v1610_v0, %v2914_v8  ;;  %v1644_v18 = vcombine.low %v1622_v3, %v1626_v11  ;;  %v1660_v19 = vcombine.low %v1630_v5, %v1634_v6  ;;  %v1735_v20 = vrot.slane %v1706_v50, %v2914_v8 }
 0x1ca   : > { %v1651_v21 = vrot.slane %v1643_v13, %v2933_v15  ;;  %v1739_v22 = vrot.slane %v1720_v60, %v2914_v8  ;;  %v1743_v23 = vrot.slane %v1728_v4, %v2914_v8  ;;  %v1747_v24 = vrot.slane %v1730_v14, %v2914_v8 }
 0x1cb   : > { %v2537_v25 = vpop.eup %2536  ;;  %v1658_v26 = vrot.slane %v1644_v18, %v2933_v15  ;;  %v1661_v27 = vcombine.low %v1638_v12, %v1642_v17  ;;  %v1668_v28 = vrot.slane %v1660_v19, %v2933_v15  ;;  %v1751_v29 = vrot.slane %v1713_v59, %v2914_v8 }
 0x1cc   : > { %v1755_v30 = vrot.slane %v1727_v10, %v2914_v8  ;;  %v1759_v31 = vrot.slane %v1729_v58, %v2914_v8  ;;  %v1763_v32 = vrot.slane %v1731_v16, %v2914_v8  ;;  %v1764_v33 = vcombine.low %v1735_v20, %v1739_v22 }
 0x1cd   : > { %v2539_v34 = vpop.eup %2538  ;;  %v1659_v35 = vcombine.low %v1651_v21, %v1658_v26  ;;  %v1675_v36 = vrot.slane %v1661_v27, %v2933_v15  ;;  %v1765_v37 = vcombine.low %v1743_v23, %v1747_v24  ;;  %v1244_v38 = vadd.f32 1.0, %v2537_v25 }
 0x1ce   : > { %v1781_v39 = vcombine.low %v1751_v29, %v1755_v30  ;;  %v1782_v40 = vcombine.low %v1759_v31, %v1763_v32  ;;  %v1245_v41 = vadd.f32 1.0, %v2539_v34  ;;  %v1772_v44 = vrot.slane %v1764_v33, %v2933_v15 }
 0x1cf   : > { %v1676_v43 = vcombine.low %v1668_v28, %v1675_v36  ;;  %2417 = vst [vmem:[%s2965_s20 + $0x20] sm:$0xff] %v1659_v35  ;;  %v1779_v45 = vrot.slane %v1765_v37, %v2933_v15  ;;  %v1252_v46 = vmul.f32 0.5, %v1244_v38  ;;  %v614_v53 = vrot.slane %v2916_v9, %v613_v51 }
 0x1d0   : > { %v1789_v47 = vrot.slane %v1781_v39, %v2933_v15  ;;  %v1796_v48 = vrot.slane %v1782_v40, %v2933_v15  ;;  %v1253_v49 = vmul.f32 0.5, %v1245_v41  ;;  %v618_v55 = vrot.slane %v2916_v9, %v617_v42 }
 0x1d1   : > { %2418 = vst [vmem:[%s2965_s20 + $0x28] sm:$0xff] %v1676_v43  ;;  %v1780_v50 = vcombine.low %v1772_v44, %v1779_v45  ;;  %v1260_v52 = vmul.f32 0.5, %v1252_v46 }
 0x1d2   : > { %v1797_v54 = vcombine.low %v1789_v47, %v1796_v48  ;;  %v1261_v7 = vmul.f32 0.5, %v1253_v49 }
 0x1d3   : > { %2419 = vst [vmem:[%s2965_s20 + $0x30] sm:$0xff] %v1780_v50  ;;  %2540 = vtanh.f32 %v1260_v52 }
 0x1d4   : > { %2420 = vst [vmem:[%s2965_s20 + $0x38] sm:$0xff] %v1797_v54  ;;  %2542 = vtanh.f32 %v1261_v7 }
 0x1d5   : > { %v1148_v56 = vpop.f32.mrf.mxu1  ;;  %v1219_v59 = vpop.f32.mrf.mxu0 }
 0x1d6   : > { %v1149_v57 = vadd.f32 %v1148_v56, %v614_v53 }
 0x1d7   : > { %v1150_v60 = vpop.f32.mrf.mxu1  ;;  %v1221_v63 = vpop.f32.mrf.mxu0 }
 0x1d8   : > { %v1220_v61 = vadd.f32 %v1219_v59, %v1149_v57  ;;  %v1151_v62 = vadd.f32 %v1150_v60, %v618_v55 }
 0x1da   : > { %v1230_v2 = vmul.f32 0.5, %v1220_v61  ;;  %v1222_v3 = vadd.f32 %v1221_v63, %v1151_v62 }
 0x1dc   : > { %2544 = vtanh.f32 %v1230_v2  ;;  %v1231_v5 = vmul.f32 0.5, %v1222_v3 }
 0x1de   : > { %2546 = vtanh.f32 %v1231_v5 }
 0x1e0   : > { %v2541_v51 = vpop.eup %2540 }
 0x1e1   : > { %v2543_v10 = vpop.eup %2542  ;;  %v1276_v4 = vadd.f32 1.0, %v2541_v51 }
 0x1e2   : > { %v1277_v0 = vadd.f32 1.0, %v2543_v10 }
 0x1e3   : > { %v1284_v11 = vmul.f32 0.5, %v1276_v4 }
 0x1e4   : > { %v1285_v9 = vmul.f32 0.5, %v1277_v0 }
 0x1e5   : > { %v1292_v6 = vmul.f32 0.5, %v1284_v11 }
 0x1e6   : > { %v1293_v12 = vmul.f32 0.5, %v1285_v9 }
 0x1e7   : > { %2548 = vtanh.f32 %v1292_v6 }
 0x1e8   : > { %2550 = vtanh.f32 %v1293_v12 }
 0x1e9   : > { %v2545_v13 = vpop.eup %2544 }
 0x1ea   : > { %v1246_v14 = vadd.f32 1.0, %v2545_v13 }
 0x1eb   : > { %v2547_v58 = vpop.eup %2546 }
 0x1ec   : > { %v1247_v16 = vadd.f32 1.0, %v2547_v58  ;;  %v1254_v17 = vmul.f32 0.5, %v1246_v14 }
 0x1ee   : > { %v1255_v18 = vmul.f32 0.5, %v1247_v16  ;;  %v1262_v19 = vmul.f32 0.5, %v1254_v17 }
 0x1f0   : > { %v1263_v21 = vmul.f32 0.5, %v1255_v18  ;;  %2552 = vtanh.f32 %v1262_v19 }
 0x1f2   : > { %2554 = vtanh.f32 %v1263_v21 }
 0x1f4   : > { %v2549_v20 = vpop.eup %2548 }
 0x1f5   : > { %v2551_v22 = vpop.eup %2550  ;;  %v1308_v23 = vadd.f32 1.0, %v2549_v20 }
 0x1f6   : > { %v1309_v24 = vadd.f32 1.0, %v2551_v22 }
 0x1f7   : > { %v1316_v25 = vmul.f32 0.5, %v1308_v23 }
 0x1f8   : > { %v1317_v26 = vmul.f32 0.5, %v1309_v24 }
 0x1f9   : > { %v1804_v27 = vcombine.high %v1316_v25, %v1316_v25  ;;  %v1811_v28 = vrot.slane %v1316_v25, %v2927_v1 }
 0x1fa   : > { %v1925_v29 = vcombine.high %v1317_v26, %v1317_v26  ;;  %v1932_v30 = vrot.slane %v1317_v26, %v2927_v1 }
 0x1fb   : > { %v1818_v31 = vrot.slane %v1804_v27, %v2927_v1  ;;  %v1819_v32 = vcombine.high %v1811_v28, %v1811_v28  ;;  %v1827_v33 = vrot.slane %v1811_v28, %v2927_v1 }
 0x1fc   : > { %v1939_v34 = vrot.slane %v1925_v29, %v2927_v1  ;;  %v1940_v35 = vcombine.high %v1932_v30, %v1932_v30  ;;  %v1948_v36 = vrot.slane %v1932_v30, %v2927_v1 }
 0x1fd   : > { %v1820_v37 = vcombine.high %v1818_v31, %v1818_v31  ;;  %v1834_v38 = vrot.slane %v1818_v31, %v2927_v1  ;;  %v1841_v39 = vrot.slane %v1819_v32, %v2927_v1  ;;  %v1849_v40 = vcombine.high %v1827_v33, %v1827_v33  ;;  %v2553_v5 = vpop.eup %2552 }
 0x1fe   : > { %v1856_v41 = vrot.slane %v1827_v33, %v2914_v8  ;;  %v1941_v42 = vcombine.high %v1939_v34, %v1939_v34  ;;  %v1955_v43 = vrot.slane %v1939_v34, %v2927_v1  ;;  %v1962_v44 = vrot.slane %v1940_v35, %v2927_v1 }
 0x1ff   : > { %v1848_v45 = vrot.slane %v1820_v37, %v2927_v1  ;;  %v1850_v46 = vcombine.high %v1834_v38, %v1834_v38  ;;  %v1851_v47 = vcombine.high %v1841_v39, %v1841_v39  ;;  %v1860_v48 = vrot.slane %v1841_v39, %v2914_v8  ;;  %v2555_v11 = vpop.eup %2554 }
 0x200   : > { %v1864_v49 = vrot.slane %v1849_v40, %v2914_v8  ;;  %v1872_v50 = vrot.slane %v1834_v38, %v2914_v8  ;;  %v1969_v52 = vrot.slane %v1941_v42, %v2927_v1  ;;  %v1970_v53 = vcombine.high %v1948_v36, %v1948_v36 }
 0x201   : > { %v1852_v54 = vcombine.high %v1848_v45, %v1848_v45  ;;  %v1868_v7 = vrot.slane %v1851_v47, %v2914_v8  ;;  %v1876_v55 = vrot.slane %v1848_v45, %v2914_v8  ;;  %v1880_v56 = vrot.slane %v1850_v46, %v2914_v8 }
 0x202   : > { %v1885_v57 = vcombine.low %v1856_v41, %v1860_v48  ;;  %v1971_v59 = vcombine.high %v1955_v43, %v1955_v43  ;;  %v1972_v60 = vcombine.high %v1962_v44, %v1962_v44  ;;  %v1973_v61 = vcombine.high %v1969_v52, %v1969_v52 }
 0x203   : > { %v1884_v62 = vrot.slane %v1852_v54, %v2914_v8  ;;  %v1886_v63 = vcombine.low %v1864_v49, %v1868_v7  ;;  %v1902_v2 = vcombine.low %v1872_v50, %v1876_v55  ;;  %v1977_v3 = vrot.slane %v1948_v36, %v2914_v8 }
 0x204   : > { %v1893_v51 = vrot.slane %v1885_v57, %v2933_v15  ;;  %v1981_v10 = vrot.slane %v1962_v44, %v2914_v8  ;;  %v1985_v4 = vrot.slane %v1970_v53, %v2914_v8  ;;  %v1989_v0 = vrot.slane %v1972_v60, %v2914_v8 }
 0x205   : > { %v1900_v9 = vrot.slane %v1886_v63, %v2933_v15  ;;  %v1903_v6 = vcombine.low %v1880_v56, %v1884_v62  ;;  %v1910_v12 = vrot.slane %v1902_v2, %v2933_v15  ;;  %v1993_v13 = vrot.slane %v1955_v43, %v2914_v8 }
 0x206   : > { %v1997_v58 = vrot.slane %v1969_v52, %v2914_v8  ;;  %v2001_v14 = vrot.slane %v1971_v59, %v2914_v8  ;;  %v2005_v16 = vrot.slane %v1973_v61, %v2914_v8  ;;  %v2006_v17 = vcombine.low %v1977_v3, %v1981_v10 }
 0x207   : > { %v1901_v18 = vcombine.low %v1893_v51, %v1900_v9  ;;  %v1917_v19 = vrot.slane %v1903_v6, %v2933_v15  ;;  %v2007_v20 = vcombine.low %v1985_v4, %v1989_v0  ;;  %v1278_v21 = vadd.f32 1.0, %v2553_v5 }
 0x208   : > { %v2023_v22 = vcombine.low %v1993_v13, %v1997_v58  ;;  %v2024_v23 = vcombine.low %v2001_v14, %v2005_v16  ;;  %v1279_v24 = vadd.f32 1.0, %v2555_v11  ;;  %v2014_v26 = vrot.slane %v2006_v17, %v2933_v15 }
 0x209   : > { %v1918_v25 = vcombine.low %v1910_v12, %v1917_v19  ;;  %2421 = vst [vmem:[%s2965_s20 + $0x40] sm:$0xff] %v1901_v18  ;;  %v2021_v27 = vrot.slane %v2007_v20, %v2933_v15  ;;  %v1286_v28 = vmul.f32 0.5, %v1278_v21 }
 0x20a   : > { %v2031_v29 = vrot.slane %v2023_v22, %v2933_v15  ;;  %v2038_v30 = vrot.slane %v2024_v23, %v2933_v15  ;;  %v1287_v31 = vmul.f32 0.5, %v1279_v24 }
 0x20b   : > { %2422 = vst [vmem:[%s2965_s20 + $0x48] sm:$0xff] %v1918_v25  ;;  %v2022_v32 = vcombine.low %v2014_v26, %v2021_v27  ;;  %v1294_v33 = vmul.f32 0.5, %v1286_v28 }
 0x20c   : > { %v2039_v34 = vcombine.low %v2031_v29, %v2038_v30  ;;  %v1295_v35 = vmul.f32 0.5, %v1287_v31 }
 0x20d   : > { %2423 = vst [vmem:[%s2965_s20 + $0x50] sm:$0xff] %v2022_v32  ;;  %2556 = vtanh.f32 %v1294_v33 }
 0x20e   : > { %2424 = vst [vmem:[%s2965_s20 + $0x58] sm:$0xff] %v2039_v34  ;;  %2558 = vtanh.f32 %v1295_v35 }
 0x21a   : > { %v2557_v36 = vpop.eup %2556 }
 0x21b   : > { %v2559_v37 = vpop.eup %2558  ;;  %v1310_v38 = vadd.f32 1.0, %v2557_v36 }
 0x21c   : > { %v1311_v39 = vadd.f32 1.0, %v2559_v37 }
 0x21d   : > { %v1318_v40 = vmul.f32 0.5, %v1310_v38 }
 0x21e   : > { %v1319_v41 = vmul.f32 0.5, %v1311_v39 }
 0x21f   : > { %v2046_v42 = vcombine.high %v1318_v40, %v1318_v40  ;;  %v2053_v43 = vrot.slane %v1318_v40, %v2927_v1 }
 0x220   : > { %v2167_v44 = vcombine.high %v1319_v41, %v1319_v41  ;;  %v2174_v45 = vrot.slane %v1319_v41, %v2927_v1 }
 0x221   : > { %v2060_v46 = vrot.slane %v2046_v42, %v2927_v1  ;;  %v2061_v47 = vcombine.high %v2053_v43, %v2053_v43  ;;  %v2069_v48 = vrot.slane %v2053_v43, %v2927_v1 }
 0x222   : > { %v2181_v49 = vrot.slane %v2167_v44, %v2927_v1  ;;  %v2182_v50 = vcombine.high %v2174_v45, %v2174_v45  ;;  %v2190_v52 = vrot.slane %v2174_v45, %v2927_v1 }
 0x223   : > { %v2062_v53 = vcombine.high %v2060_v46, %v2060_v46  ;;  %v2076_v54 = vrot.slane %v2060_v46, %v2927_v1  ;;  %v2083_v7 = vrot.slane %v2061_v47, %v2927_v1  ;;  %v2091_v55 = vcombine.high %v2069_v48, %v2069_v48 }
 0x224   : > { %v2183_v56 = vcombine.high %v2181_v49, %v2181_v49  ;;  %v2197_v57 = vrot.slane %v2181_v49, %v2927_v1  ;;  %v2204_v59 = vrot.slane %v2182_v50, %v2927_v1  ;;  %v2098_v2 = vrot.slane %v2069_v48, %v2914_v8 }
 0x225   : > { %v2090_v60 = vrot.slane %v2062_v53, %v2927_v1  ;;  %v2092_v61 = vcombine.high %v2076_v54, %v2076_v54  ;;  %v2093_v62 = vcombine.high %v2083_v7, %v2083_v7  ;;  %v2102_v63 = vrot.slane %v2083_v7, %v2914_v8 }
 0x226   : > { %v2106_v3 = vrot.slane %v2091_v55, %v2914_v8  ;;  %v2114_v5 = vrot.slane %v2076_v54, %v2914_v8  ;;  %v2211_v51 = vrot.slane %v2183_v56, %v2927_v1  ;;  %v2212_v11 = vcombine.high %v2190_v52, %v2190_v52 }
 0x227   : > { %v2094_v10 = vcombine.high %v2090_v60, %v2090_v60  ;;  %v2110_v4 = vrot.slane %v2093_v62, %v2914_v8  ;;  %v2118_v0 = vrot.slane %v2090_v60, %v2914_v8  ;;  %v2127_v9 = vcombine.low %v2098_v2, %v2102_v63 }
 0x228   : > { %v2213_v6 = vcombine.high %v2197_v57, %v2197_v57  ;;  %v2214_v12 = vcombine.high %v2204_v59, %v2204_v59  ;;  %v2215_v13 = vcombine.high %v2211_v51, %v2211_v51  ;;  %v2122_v58 = vrot.slane %v2092_v61, %v2914_v8 }
 0x229   : > { %v2126_v14 = vrot.slane %v2094_v10, %v2914_v8  ;;  %v2128_v16 = vcombine.low %v2106_v3, %v2110_v4  ;;  %v2144_v17 = vcombine.low %v2114_v5, %v2118_v0  ;;  %v2135_v18 = vrot.slane %v2127_v9, %v2933_v15 }
 0x22a   : > { %v2219_v1 = vrot.slane %v2190_v52, %v2914_v8  ;;  %v2223_v19 = vrot.slane %v2204_v59, %v2914_v8  ;;  %v2231_v20 = vrot.slane %v2214_v12, %v2914_v8  ;;  %v2227_v23 = vrot.slane %v2212_v11, %v2914_v8 }
 0x22b   : > { %v2142_v21 = vrot.slane %v2128_v16, %v2933_v15  ;;  %v2145_v22 = vcombine.low %v2122_v58, %v2126_v14  ;;  %v2235_v24 = vrot.slane %v2197_v57, %v2914_v8  ;;  %v2239_v25 = vrot.slane %v2211_v51, %v2914_v8 }
 0x22c   : > { %v2243_v26 = vrot.slane %v2213_v6, %v2914_v8  ;;  %v2247_v27 = vrot.slane %v2215_v13, %v2914_v8  ;;  %v2248_v28 = vcombine.low %v2219_v1, %v2223_v19  ;;  %v2152_v30 = vrot.slane %v2144_v17, %v2933_v15 }
 0x22d   : > { %v2143_v29 = vcombine.low %v2135_v18, %v2142_v21  ;;  %v2159_v31 = vrot.slane %v2145_v22, %v2933_v15  ;;  %v2249_v32 = vcombine.low %v2227_v23, %v2231_v20  ;;  %v2265_v33 = vcombine.low %v2235_v24, %v2239_v25 }
 0x22e   : > { %v2266_v34 = vcombine.low %v2243_v26, %v2247_v27  ;;  %v2256_v8 = vrot.slane %v2248_v28, %v2933_v15 }
 0x22f   : > { %v2160_v35 = vcombine.low %v2152_v30, %v2159_v31  ;;  %2425 = vst [vmem:[%s2965_s20 + $0x60] sm:$0xff] %v2143_v29  ;;  %v2263_v36 = vrot.slane %v2249_v32, %v2933_v15  ;;  %v2273_v37 = vrot.slane %v2265_v33, %v2933_v15 }
 0x230   : > { %v2280_v38 = vrot.slane %v2266_v34, %v2933_v15 }
 0x231   : > { %2426 = vst [vmem:[%s2965_s20 + $0x68] sm:$0xff] %v2160_v35  ;;  %v2264_v39 = vcombine.low %v2256_v8, %v2263_v36 }
 0x232   : > { %v2281_v40 = vcombine.low %v2273_v37, %v2280_v38 }
 0x233   : > { %2427 = vst [vmem:[%s2965_s20 + $0x70] sm:$0xff] %v2264_v39 }
 0x234   : > { %2428 = vst [vmem:[%s2965_s20 + $0x78] sm:$0xff] %v2281_v40 }
 0x235   : > { %2654 = shalt.err (!%p2651_p9)
}
 0x236   : > { %s2655_s17 = scalar_lea.hbm %s3106_s5, 2048  ;;  %s2659_s27 = scalar_lea.hbm %s3156_s3, 4096 }
 0x237   : > { %p2656_p13 = scmp.ne.s32.totalorder %s3106_s5, %s2655_s17  ;;  %p2660_p0 = scmp.lt.s32.totalorder %s3106_s5, %s3156_s3 }
 0x238   : > { %p2661_p4 = scmp.lt.s32.totalorder %s2659_s27, %s2655_s17 }
 0x239   : > { %p2657_p5 = pnand %p2656_p13, %p3172_p11 }
 0x23a   : > { %p2662_p8 = por %p2661_p4, %p2660_p0 }
 0x23b   : > { %p2658_p10 = pneg %p2657_p5 }
 0x23d   : > { %p2663_p3 = pnand %p2662_p8, %p2658_p10 }
 0x23f   : > { %2666 = shalt.err (!%p2663_p3)
}
 0x240   : > { %s2720_s18 = smov 128   ;;  %s2721_s20 = smov 8  }
 0x241   : > { %2448 = dma.vmem_to_hbm [thread:$0]  (%p3172_p11), %s3108_s26, 2048, %s3106_s5, %s2288_s16, %s2720_s18, %s2720_s18, %s2721_s20  }
 0x242 PF: > { %s2316_s23 = sand.u32 1, %s2697_s12   ;;  %p3173_p1 = scmp.ne.s32.totalorder %s3162_s19, 0 }
 0x243   : > { %p3174_p2 = scmp.ge.s32.totalorder %s2709_s15, 2  ;;  %s2317_s28 = scalar_lea.sflag [#allocation4], %s2316_s23 }
 0x245   : > { %p2462_p6 = pnand %p3174_p2, %p3173_p1 }
 0x247   : > { %p2463_p12 = pneg %p2462_p6 }
 0x249   : > { %2692 = dma.done.wait (%p2463_p12), %s2317_s28, 2048  }
 0x24a   : > { %2694 = vsyncadd (%p2463_p12), %s2317_s28, 4294965248  ;;  %p17_p7 = scmp.ge.s32.totalorder %s2814_s7, 4   ;;  %s3175_s12 = smov %s2701_s13 }
 0x24b   : > { %s3176_s13 = smov %s2705_s14  ;;  %s3177_s14 = smov %s2830_s11 }
 0x24c   : > { %s3178_s15 = smov %s2814_s7  ;;  %19 = sbr.rel (!%p17_p7) target bundleno = 6 (0x6), region = 92 }
 0x251   :  { %2322 = vsyncpa [#allocation3], 1 }
 0x252   :  { %2324 = vsyncpa [#allocation3 + $0x1], 1 }
 0x253   :  { %2325 = vsyncpa [#allocation6], 1 }
 0x254   :  { %2326 = vsyncpa [#allocation4], 1 }
 0x255   :  { %2328 = vsyncpa [#allocation4 + $0x1], 1 }

</bundles_post_ra>
